<compile_context>
chip_gen: v6e
topology: v6e:2x2x1
jax: 0.10.0
libtpu: 0.0.40
codegen_flags: <defaults>
</compile_context>

<pallas_src>
import jax
import jax.numpy as jnp
from jax import lax
from jax.experimental import pallas as pl
from jax.experimental.pallas import tpu as pltpu

# ---- model hyper-parameters (small, consistent with the module) -------------
VOCAB = 65
N_EMBED = 32
BLOCK_SIZE = 8
NUM_HEADS = 4
N_LAYERS = 2
HEAD_SIZE = N_EMBED // NUM_HEADS
FF_HIDDEN = 4 * N_EMBED
LN_EPS = 1e-5
VPAD = 128            # vocab padded to a full 128-lane tile (lane-dense stores)
PER_LAYER = 13        # number of parameter tensors per decoder block


def _layernorm(x, gamma, beta):
    # PyTorch nn.LayerNorm semantics: biased variance, eps inside rsqrt.
    mu = jnp.mean(x, axis=-1, keepdims=True)
    var = jnp.mean((x - mu) ** 2, axis=-1, keepdims=True)
    return (x - mu) * lax.rsqrt(var + LN_EPS) * gamma + beta


# ----------------------------- fused Pallas kernel ----------------------------
def _make_forward_kernel(bblk, T, C, n_layers, n_heads):
    HS = C // n_heads
    BT = bblk * T
    scale = HS ** -0.5

    def kernel(idx_ref, tok_ref, pos_ref, *rest):
        layer_refs = rest[:PER_LAYER * n_layers]
        lnfg_ref, lnfb_ref, wh_ref, bh_ref, out_ref = rest[PER_LAYER * n_layers:]

        # ---- fused token + position embedding (one-hot matmul gather) -------
        ids = idx_ref[...]                                        # (bblk, T, 1) i32
        classes = lax.broadcasted_iota(jnp.int32, (bblk, T, VPAD), 2)
        onehot = (ids == classes).astype(jnp.float32)             # (bblk, T, VPAD)
        tok = jnp.dot(onehot.reshape(BT, VPAD), tok_ref[...],
                      preferred_element_type=jnp.float32)         # (BT, C)
        x = (tok.reshape(bblk, T, C) + pos_ref[...][None]).reshape(BT, C)

        # ---- causal mask: built once, reused by every layer / head ----------
        row = lax.broadcasted_iota(jnp.int32, (T, T), 0)
        col = lax.broadcasted_iota(jnp.int32, (T, T), 1)
        causal = (row >= col)[None]                               # (1, T, T)

        def split_heads(z):
            # (BT, C) -> (n_heads * bblk, T, HS), head-major groups.
            z3 = z.reshape(bblk, T, C)
            return jnp.concatenate(
                [z3[:, :, h * HS:(h + 1) * HS] for h in range(n_heads)], axis=0)

        for l in range(n_layers):
            (wq, wk, wv, wo, bo, ln1g, ln1b, ln2g, ln2b,
             w1, b1, w2, b2) = layer_refs[PER_LAYER * l:PER_LAYER * (l + 1)]

            # --- multi-head causal self-attention (heads batched) ------------
            xn = _layernorm(x, ln1g[...], ln1b[...])
            q = jnp.dot(xn, wq[...], preferred_element_type=jnp.float32)
            k = jnp.dot(xn, wk[...], preferred_element_type=jnp.float32)
            v = jnp.dot(xn, wv[...], preferred_element_type=jnp.float32)
            qg, kg, vg = split_heads(q), split_heads(k), split_heads(v)

            att = jnp.einsum('gqd,gkd->gqk', qg, kg,
                             preferred_element_type=jnp.float32) * scale
            att = jnp.where(causal, att, -jnp.inf)
            att = att - jnp.max(att, axis=-1, keepdims=True)
            p = jnp.exp(att)
            p = p * pl.reciprocal(jnp.sum(p, axis=-1, keepdims=True), approx=True)
            og = jnp.einsum('gqk,gkd->gqd', p, vg,
                            preferred_element_type=jnp.float32)   # (H*bblk, T, HS)

            # single batched output projection through Wo (H, HS, C), summed
            # over heads -- equivalent to concat(heads) @ Wo.
            og3 = og.reshape(n_heads, BT, HS)
            sa = jnp.einsum('hnd,hdc->hnc', og3, wo[...],
                            preferred_element_type=jnp.float32)   # (H, BT, C)
            x = x + jnp.sum(sa, axis=0) + bo[...]

            # --- feed-forward -------------------------------------------------
            xn2 = _layernorm(x, ln2g[...], ln2b[...])
            hid = jnp.maximum(
                jnp.dot(xn2, w1[...], preferred_element_type=jnp.float32) + b1[...],
                0.0)
            x = x + jnp.dot(hid, w2[...],
                            preferred_element_type=jnp.float32) + b2[...]

        # ---- final LayerNorm + lm_head (lane-dense, vocab padded to 128) ----
        xn = _layernorm(x, lnfg_ref[...], lnfb_ref[...])
        logits = jnp.dot(xn, wh_ref[...],
                         preferred_element_type=jnp.float32) + bh_ref[...]
        out_ref[...] = logits.reshape(bblk, T, VPAD)

    return kernel


# ------------------------------- wrappers --------------------------------------
def _const_spec(shape):
    # Whole-array block, constant across the grid (weights stay VMEM resident).
    zeros = (0,) * len(shape)
    return pl.BlockSpec(shape, lambda i, _z=zeros: _z)


def cross_entropy_ignore0(logits, targets):
    # F.cross_entropy(..., ignore_index=0): mean over non-ignored positions.
    B, T, V = logits.shape
    lf = logits.reshape(B * T, V)
    tf = targets.reshape(B * T)
    logz = jax.nn.logsumexp(lf, axis=-1)
    ll = jnp.take_along_axis(lf, tf[:, None], axis=-1)[:, 0]
    nll = logz - ll
    mask = (tf != 0).astype(jnp.float32)
    return jnp.sum(nll * mask) / jnp.maximum(jnp.sum(mask), 1.0)


def bigram_forward(idx, params, targets=None, b_block=None):
    B, T = idx.shape
    C = N_EMBED

    # Batch-block size: as large as possible (M = b_block*T feeds the MXU;
    # target multiples of 128/256 on v5e/v6e). With B // b_block >= 2 the grid
    # is "parallel", so v7x's two TensorCores are both used.
    if b_block is None:
        b_block = 1
        for cand in range(1, min(B, 128) + 1):
            if B % cand == 0:
                b_block = cand
    assert B % b_block == 0
    n_blocks = B // b_block

    # Pad vocab dims to a full 128-lane tile: lane-dense logits stores and an
    # aligned one-hot gather matmul. Padded logit columns are sliced off below.
    tok_emb_pad = jnp.zeros((VPAD, C), jnp.float32).at[:VOCAB].set(params["tok_emb"])
    wh_pad = jnp.zeros((C, VPAD), jnp.float32).at[:, :VOCAB].set(params["wh"])
    bh_pad = jnp.full((1, VPAD), -1e30, jnp.float32).at[:, :VOCAB].set(params["bh"])

    idx_e = idx.astype(jnp.int32)[..., None]                      # (B, T, 1)

    layer_args = []
    for p in params["layers"]:
        layer_args += [
            p["wq"], p["wk"], p["wv"],
            p["wo"].reshape(NUM_HEADS, HEAD_SIZE, N_EMBED),       # head-split Wo
            p["bo"], p["ln1g"], p["ln1b"], p["ln2g"], p["ln2b"],
            p["w1"], p["b1"], p["w2"], p["b2"],
        ]
    const_args = ([tok_emb_pad, params["pos_emb"][:T]] + layer_args
                  + [params["lnfg"], params["lnfb"], wh_pad, bh_pad])

    in_specs = [pl.BlockSpec((b_block, T, 1), lambda i: (i, 0, 0))]
    in_specs += [_const_spec(a.shape) for a in const_args]

    kernel = _make_forward_kernel(b_block, T, C, len(params["layers"]), NUM_HEADS)

    logits_pad = pl.pallas_call(
        kernel,
        out_shape=jax.ShapeDtypeStruct((B, T, VPAD), jnp.float32),
        grid=(n_blocks,),
        in_specs=in_specs,
        out_specs=pl.BlockSpec((b_block, T, VPAD), lambda i: (i, 0, 0)),
        compiler_params=pltpu.CompilerParams(
            dimension_semantics=("parallel",)),
    )(idx_e, *const_args)

    logits = logits_pad[..., :VOCAB]
    loss = None if targets is None else cross_entropy_ignore0(logits, targets)
    return logits, loss


# --------------------------- pure-JAX reference --------------------------------
def forward_ref(idx, params):
    B, T = idx.shape
    tok = jnp.take(params["tok_emb"], idx, axis=0)
    x = tok + params["pos_emb"][:T][None]

    def ln(z, g, b):
        mu = z.mean(-1, keepdims=True)
        var = ((z - mu) ** 2).mean(-1, keepdims=True)
        return (z - mu) / jnp.sqrt(var + LN_EPS) * g + b

    mask = jnp.tril(jnp.ones((T, T), bool))
    for p in params["layers"]:
        xn = ln(x, p["ln1g"], p["ln1b"])
        q, k, v = xn @ p["wq"], xn @ p["wk"], xn @ p["wv"]
        qh = q.reshape(B, T, NUM_HEADS, HEAD_SIZE).transpose(0, 2, 1, 3)
        kh = k.reshape(B, T, NUM_HEADS, HEAD_SIZE).transpose(0, 2, 1, 3)
        vh = v.reshape(B, T, NUM_HEADS, HEAD_SIZE).transpose(0, 2, 1, 3)
        att = (qh @ kh.transpose(0, 1, 3, 2)) * (HEAD_SIZE ** -0.5)
        att = jnp.where(mask, att, -jnp.inf)
        w = jax.nn.softmax(att, axis=-1)
        out = (w @ vh).transpose(0, 2, 1, 3).reshape(B, T, N_EMBED)
        x = x + out @ p["wo"] + p["bo"]
        xn2 = ln(x, p["ln2g"], p["ln2b"])
        x = x + jnp.maximum(xn2 @ p["w1"] + p["b1"], 0.0) @ p["w2"] + p["b2"]
    xn = ln(x, params["lnfg"], params["lnfb"])
    return xn @ params["wh"] + params["bh"]


# --------------------------- deterministic params ------------------------------
def init_params(key):
    def nrm(k, shape):
        return 0.02 * jax.random.normal(k, shape, jnp.float32)

    keys = jax.random.split(key, 3 + 6 * N_LAYERS)
    params = {
        "tok_emb": nrm(keys[0], (VOCAB, N_EMBED)),
        "pos_emb": nrm(keys[1], (BLOCK_SIZE, N_EMBED)),
        "lnfg": jnp.ones((1, N_EMBED), jnp.float32),
        "lnfb": jnp.zeros((1, N_EMBED), jnp.float32),
        "wh": nrm(keys[2], (N_EMBED, VOCAB)),
        "bh": jnp.zeros((1, VOCAB), jnp.float32),
        "layers": [],
    }
    for l in range(N_LAYERS):
        k = keys[3 + 6 * l: 3 + 6 * (l + 1)]
        params["layers"].append({
            "wq": nrm(k[0], (N_EMBED, N_EMBED)),
            "wk": nrm(k[1], (N_EMBED, N_EMBED)),
            "wv": nrm(k[2], (N_EMBED, N_EMBED)),
            "wo": nrm(k[3], (N_EMBED, N_EMBED)),
            "bo": jnp.zeros((1, N_EMBED), jnp.float32),
            "ln1g": jnp.ones((1, N_EMBED), jnp.float32),
            "ln1b": jnp.zeros((1, N_EMBED), jnp.float32),
            "ln2g": jnp.ones((1, N_EMBED), jnp.float32),
            "ln2b": jnp.zeros((1, N_EMBED), jnp.float32),
            "w1": nrm(k[4], (N_EMBED, FF_HIDDEN)),
            "b1": jnp.zeros((1, FF_HIDDEN), jnp.float32),
            "w2": nrm(k[5], (FF_HIDDEN, N_EMBED)),
            "b2": jnp.zeros((1, N_EMBED), jnp.float32),
        })
    return params


if __name__ == "__main__":
    key = jax.random.PRNGKey(0)
    pkey, ikey = jax.random.split(key)
    params = init_params(pkey)

    B, T = 2, BLOCK_SIZE
    idx = jax.random.randint(ikey, (B, T), 0, VOCAB, dtype=jnp.int32)

    logits, loss = bigram_forward(idx, params, targets=None)
    logits = jax.block_until_ready(logits)
    assert logits.shape == (B, T, VOCAB) and loss is None
    assert bool(jnp.all(jnp.isfinite(logits)))

    # correctness check against a pure-JAX reference (approx-reciprocal softmax
    # introduces only ~1e-4-level deviations at these scales).
    ref = forward_ref(idx, params)
    max_err = float(jnp.max(jnp.abs(logits - ref)))
    assert jnp.allclose(logits, ref, atol=1e-2, rtol=1e-2), max_err

    print("KERNEL_OK")
</pallas_src>

<mosaic_0001>
module attributes {stable_mosaic.version = 11 : i64} {
  func.func @kernel(%arg0: i32, %arg1: memref<2x8x1xi32, #tpu.memory_space<vmem>>, %arg2: memref<128x32xf32, #tpu.memory_space<vmem>>, %arg3: memref<8x32xf32, #tpu.memory_space<vmem>>, %arg4: memref<32x32xf32, #tpu.memory_space<vmem>>, %arg5: memref<32x32xf32, #tpu.memory_space<vmem>>, %arg6: memref<32x32xf32, #tpu.memory_space<vmem>>, %arg7: memref<4x8x32xf32, #tpu.memory_space<vmem>>, %arg8: memref<1x32xf32, #tpu.memory_space<vmem>>, %arg9: memref<1x32xf32, #tpu.memory_space<vmem>>, %arg10: memref<1x32xf32, #tpu.memory_space<vmem>>, %arg11: memref<1x32xf32, #tpu.memory_space<vmem>>, %arg12: memref<1x32xf32, #tpu.memory_space<vmem>>, %arg13: memref<32x128xf32, #tpu.memory_space<vmem>>, %arg14: memref<1x128xf32, #tpu.memory_space<vmem>>, %arg15: memref<128x32xf32, #tpu.memory_space<vmem>>, %arg16: memref<1x32xf32, #tpu.memory_space<vmem>>, %arg17: memref<32x32xf32, #tpu.memory_space<vmem>>, %arg18: memref<32x32xf32, #tpu.memory_space<vmem>>, %arg19: memref<32x32xf32, #tpu.memory_space<vmem>>, %arg20: memref<4x8x32xf32, #tpu.memory_space<vmem>>, %arg21: memref<1x32xf32, #tpu.memory_space<vmem>>, %arg22: memref<1x32xf32, #tpu.memory_space<vmem>>, %arg23: memref<1x32xf32, #tpu.memory_space<vmem>>, %arg24: memref<1x32xf32, #tpu.memory_space<vmem>>, %arg25: memref<1x32xf32, #tpu.memory_space<vmem>>, %arg26: memref<32x128xf32, #tpu.memory_space<vmem>>, %arg27: memref<1x128xf32, #tpu.memory_space<vmem>>, %arg28: memref<128x32xf32, #tpu.memory_space<vmem>>, %arg29: memref<1x32xf32, #tpu.memory_space<vmem>>, %arg30: memref<1x32xf32, #tpu.memory_space<vmem>>, %arg31: memref<1x32xf32, #tpu.memory_space<vmem>>, %arg32: memref<32x128xf32, #tpu.memory_space<vmem>>, %arg33: memref<1x128xf32, #tpu.memory_space<vmem>>, %arg34: memref<2x8x128xf32, #tpu.memory_space<vmem>>) attributes {dimension_semantics = [#tpu.dimension_semantics<parallel>], iteration_bounds = array<i64: 1>, scalar_prefetch = 0 : i64, scratch_operands = 0 : i64, tpu.core_type = #tpu.core_type<tc>, window_params = [{transform_indices = @transform_0, window_bounds = array<i64: 2, 8, 1>}, {pipeline_mode = #tpu.pipeline_mode<synchronous>, transform_indices = @transform_1, window_bounds = array<i64: 128, 32>}, {pipeline_mode = #tpu.pipeline_mode<synchronous>, transform_indices = @transform_2, window_bounds = array<i64: 8, 32>}, {pipeline_mode = #tpu.pipeline_mode<synchronous>, transform_indices = @transform_3, window_bounds = array<i64: 32, 32>}, {pipeline_mode = #tpu.pipeline_mode<synchronous>, transform_indices = @transform_4, window_bounds = array<i64: 32, 32>}, {pipeline_mode = #tpu.pipeline_mode<synchronous>, transform_indices = @transform_5, window_bounds = array<i64: 32, 32>}, {pipeline_mode = #tpu.pipeline_mode<synchronous>, transform_indices = @transform_6, window_bounds = array<i64: 4, 8, 32>}, {pipeline_mode = #tpu.pipeline_mode<synchronous>, transform_indices = @transform_7, window_bounds = array<i64: 1, 32>}, {pipeline_mode = #tpu.pipeline_mode<synchronous>, transform_indices = @transform_8, window_bounds = array<i64: 1, 32>}, {pipeline_mode = #tpu.pipeline_mode<synchronous>, transform_indices = @transform_9, window_bounds = array<i64: 1, 32>}, {pipeline_mode = #tpu.pipeline_mode<synchronous>, transform_indices = @transform_10, window_bounds = array<i64: 1, 32>}, {pipeline_mode = #tpu.pipeline_mode<synchronous>, transform_indices = @transform_11, window_bounds = array<i64: 1, 32>}, {pipeline_mode = #tpu.pipeline_mode<synchronous>, transform_indices = @transform_12, window_bounds = array<i64: 32, 128>}, {pipeline_mode = #tpu.pipeline_mode<synchronous>, transform_indices = @transform_13, window_bounds = array<i64: 1, 128>}, {pipeline_mode = #tpu.pipeline_mode<synchronous>, transform_indices = @transform_14, window_bounds = array<i64: 128, 32>}, {pipeline_mode = #tpu.pipeline_mode<synchronous>, transform_indices = @transform_15, window_bounds = array<i64: 1, 32>}, {pipeline_mode = #tpu.pipeline_mode<synchronous>, transform_indices = @transform_16, window_bounds = array<i64: 32, 32>}, {pipeline_mode = #tpu.pipeline_mode<synchronous>, transform_indices = @transform_17, window_bounds = array<i64: 32, 32>}, {pipeline_mode = #tpu.pipeline_mode<synchronous>, transform_indices = @transform_18, window_bounds = array<i64: 32, 32>}, {pipeline_mode = #tpu.pipeline_mode<synchronous>, transform_indices = @transform_19, window_bounds = array<i64: 4, 8, 32>}, {pipeline_mode = #tpu.pipeline_mode<synchronous>, transform_indices = @transform_20, window_bounds = array<i64: 1, 32>}, {pipeline_mode = #tpu.pipeline_mode<synchronous>, transform_indices = @transform_21, window_bounds = array<i64: 1, 32>}, {pipeline_mode = #tpu.pipeline_mode<synchronous>, transform_indices = @transform_22, window_bounds = array<i64: 1, 32>}, {pipeline_mode = #tpu.pipeline_mode<synchronous>, transform_indices = @transform_23, window_bounds = array<i64: 1, 32>}, {pipeline_mode = #tpu.pipeline_mode<synchronous>, transform_indices = @transform_24, window_bounds = array<i64: 1, 32>}, {pipeline_mode = #tpu.pipeline_mode<synchronous>, transform_indices = @transform_25, window_bounds = array<i64: 32, 128>}, {pipeline_mode = #tpu.pipeline_mode<synchronous>, transform_indices = @transform_26, window_bounds = array<i64: 1, 128>}, {pipeline_mode = #tpu.pipeline_mode<synchronous>, transform_indices = @transform_27, window_bounds = array<i64: 128, 32>}, {pipeline_mode = #tpu.pipeline_mode<synchronous>, transform_indices = @transform_28, window_bounds = array<i64: 1, 32>}, {pipeline_mode = #tpu.pipeline_mode<synchronous>, transform_indices = @transform_29, window_bounds = array<i64: 1, 32>}, {pipeline_mode = #tpu.pipeline_mode<synchronous>, transform_indices = @transform_30, window_bounds = array<i64: 1, 32>}, {pipeline_mode = #tpu.pipeline_mode<synchronous>, transform_indices = @transform_31, window_bounds = array<i64: 32, 128>}, {pipeline_mode = #tpu.pipeline_mode<synchronous>, transform_indices = @transform_32, window_bounds = array<i64: 1, 128>}, {transform_indices = @transform_33, window_bounds = array<i64: 2, 8, 128>}]} {
    %c0 = arith.constant 0 : index
    %c0_0 = arith.constant 0 : index
    %c0_1 = arith.constant 0 : index
    %0 = vector.load %arg1[%c0, %c0_0, %c0_1] : memref<2x8x1xi32, #tpu.memory_space<vmem>>, vector<2x8x1xi32>
    %1 = tpu.iota {dimensions = array<i32: 2>} : vector<2x8x128xi32>
    %2 = vector.broadcast %0 : vector<2x8x1xi32> to vector<2x8x128xi32>
    %3 = arith.cmpi eq, %2, %1 : vector<2x8x128xi32>
    %4 = arith.extui %3 : vector<2x8x128xi1> to vector<2x8x128xi32>
    %5 = arith.sitofp %4 : vector<2x8x128xi32> to vector<2x8x128xf32>
    %6 = vector.shape_cast %5 : vector<2x8x128xf32> to vector<16x128xf32>
    %c0_2 = arith.constant 0 : index
    %c0_3 = arith.constant 0 : index
    %7 = vector.load %arg2[%c0_2, %c0_3] : memref<128x32xf32, #tpu.memory_space<vmem>>, vector<128x32xf32>
    %cst = arith.constant dense<0.000000e+00> : vector<16x32xf32>
    %8 = tpu.matmul %6, %7, %cst {dimension_numbers = #tpu.dot_dimension_numbers<[1], [0], [0], [1], [0, 0, 1, 1], [], []>} : vector<16x128xf32>, vector<128x32xf32>, vector<16x32xf32> -> vector<16x32xf32>
    %9 = vector.shape_cast %8 : vector<16x32xf32> to vector<2x8x32xf32>
    %c0_4 = arith.constant 0 : index
    %c0_5 = arith.constant 0 : index
    %10 = vector.load %arg3[%c0_4, %c0_5] : memref<8x32xf32, #tpu.memory_space<vmem>>, vector<8x32xf32>
    %11 = vector.shape_cast %10 : vector<8x32xf32> to vector<1x8x32xf32>
    %12 = vector.broadcast %11 : vector<1x8x32xf32> to vector<2x8x32xf32>
    %13 = arith.addf %9, %12 : vector<2x8x32xf32>
    %14 = vector.shape_cast %13 : vector<2x8x32xf32> to vector<16x32xf32>
    %15 = tpu.iota {dimensions = array<i32: 0>} : vector<8x8xi32>
    %16 = tpu.iota {dimensions = array<i32: 1>} : vector<8x8xi32>
    %17 = arith.cmpi sge, %15, %16 : vector<8x8xi32>
    %18 = vector.shape_cast %17 : vector<8x8xi1> to vector<1x8x8xi1>
    %c0_6 = arith.constant 0 : index
    %c0_7 = arith.constant 0 : index
    %19 = vector.load %arg9[%c0_6, %c0_7] : memref<1x32xf32, #tpu.memory_space<vmem>>, vector<1x32xf32>
    %c0_8 = arith.constant 0 : index
    %c0_9 = arith.constant 0 : index
    %20 = vector.load %arg10[%c0_8, %c0_9] : memref<1x32xf32, #tpu.memory_space<vmem>>, vector<1x32xf32>
    %cst_10 = arith.constant dense<0.000000e+00> : vector<16xf32>
    %21 = vector.multi_reduction <add>, %14, %cst_10 [1] : vector<16x32xf32> to vector<16xf32>
    %22 = vector.shape_cast %21 : vector<16xf32> to vector<16x1xf32>
    %cst_11 = arith.constant 3.200000e+01 : f32
    %23 = vector.broadcast %cst_11 : f32 to vector<16x1xf32>
    %24 = arith.divf %22, %23 : vector<16x1xf32>
    %25 = vector.broadcast %24 : vector<16x1xf32> to vector<16x32xf32>
    %26 = arith.subf %14, %25 : vector<16x32xf32>
    %27 = arith.mulf %26, %26 : vector<16x32xf32>
    %cst_12 = arith.constant dense<0.000000e+00> : vector<16xf32>
    %28 = vector.multi_reduction <add>, %27, %cst_12 [1] : vector<16x32xf32> to vector<16xf32>
    %29 = vector.shape_cast %28 : vector<16xf32> to vector<16x1xf32>
    %cst_13 = arith.constant 3.200000e+01 : f32
    %30 = vector.broadcast %cst_13 : f32 to vector<16x1xf32>
    %31 = arith.divf %29, %30 : vector<16x1xf32>
    %32 = vector.broadcast %24 : vector<16x1xf32> to vector<16x32xf32>
    %33 = arith.subf %14, %32 : vector<16x32xf32>
    %cst_14 = arith.constant 9.99999974E-6 : f32
    %34 = vector.broadcast %cst_14 : f32 to vector<16x1xf32>
    %35 = arith.addf %31, %34 : vector<16x1xf32>
    %36 = math.rsqrt %35 : vector<16x1xf32>
    %37 = vector.broadcast %36 : vector<16x1xf32> to vector<16x32xf32>
    %38 = arith.mulf %33, %37 : vector<16x32xf32>
    %39 = vector.broadcast %19 : vector<1x32xf32> to vector<16x32xf32>
    %40 = arith.mulf %38, %39 : vector<16x32xf32>
    %41 = vector.broadcast %20 : vector<1x32xf32> to vector<16x32xf32>
    %42 = arith.addf %40, %41 : vector<16x32xf32>
    %c0_15 = arith.constant 0 : index
    %c0_16 = arith.constant 0 : index
    %43 = vector.load %arg4[%c0_15, %c0_16] : memref<32x32xf32, #tpu.memory_space<vmem>>, vector<32x32xf32>
    %cst_17 = arith.constant dense<0.000000e+00> : vector<16x32xf32>
    %44 = tpu.matmul %42, %43, %cst_17 {dimension_numbers = #tpu.dot_dimension_numbers<[1], [0], [0], [1], [0, 0, 1, 1], [], []>} : vector<16x32xf32>, vector<32x32xf32>, vector<16x32xf32> -> vector<16x32xf32>
    %c0_18 = arith.constant 0 : index
    %c0_19 = arith.constant 0 : index
    %45 = vector.load %arg5[%c0_18, %c0_19] : memref<32x32xf32, #tpu.memory_space<vmem>>, vector<32x32xf32>
    %cst_20 = arith.constant dense<0.000000e+00> : vector<16x32xf32>
    %46 = tpu.matmul %42, %45, %cst_20 {dimension_numbers = #tpu.dot_dimension_numbers<[1], [0], [0], [1], [0, 0, 1, 1], [], []>} : vector<16x32xf32>, vector<32x32xf32>, vector<16x32xf32> -> vector<16x32xf32>
    %c0_21 = arith.constant 0 : index
    %c0_22 = arith.constant 0 : index
    %47 = vector.load %arg6[%c0_21, %c0_22] : memref<32x32xf32, #tpu.memory_space<vmem>>, vector<32x32xf32>
    %cst_23 = arith.constant dense<0.000000e+00> : vector<16x32xf32>
    %48 = tpu.matmul %42, %47, %cst_23 {dimension_numbers = #tpu.dot_dimension_numbers<[1], [0], [0], [1], [0, 0, 1, 1], [], []>} : vector<16x32xf32>, vector<32x32xf32>, vector<16x32xf32> -> vector<16x32xf32>
    %49 = vector.shape_cast %44 : vector<16x32xf32> to vector<2x8x32xf32>
    %50 = vector.extract_strided_slice %49 {offsets = [0, 0, 0], sizes = [2, 8, 8], strides = [1, 1, 1]} : vector<2x8x32xf32> to vector<2x8x8xf32>
    %51 = vector.extract_strided_slice %49 {offsets = [0, 0, 8], sizes = [2, 8, 8], strides = [1, 1, 1]} : vector<2x8x32xf32> to vector<2x8x8xf32>
    %52 = vector.extract_strided_slice %49 {offsets = [0, 0, 16], sizes = [2, 8, 8], strides = [1, 1, 1]} : vector<2x8x32xf32> to vector<2x8x8xf32>
    %53 = vector.extract_strided_slice %49 {offsets = [0, 0, 24], sizes = [2, 8, 8], strides = [1, 1, 1]} : vector<2x8x32xf32> to vector<2x8x8xf32>
    %54 = tpu.concatenate %50, %51, %52, %53 in 0 : vector<2x8x8xf32>, vector<2x8x8xf32>, vector<2x8x8xf32>, vector<2x8x8xf32> -> vector<8x8x8xf32>
    %55 = vector.shape_cast %46 : vector<16x32xf32> to vector<2x8x32xf32>
    %56 = vector.extract_strided_slice %55 {offsets = [0, 0, 0], sizes = [2, 8, 8], strides = [1, 1, 1]} : vector<2x8x32xf32> to vector<2x8x8xf32>
    %57 = vector.extract_strided_slice %55 {offsets = [0, 0, 8], sizes = [2, 8, 8], strides = [1, 1, 1]} : vector<2x8x32xf32> to vector<2x8x8xf32>
    %58 = vector.extract_strided_slice %55 {offsets = [0, 0, 16], sizes = [2, 8, 8], strides = [1, 1, 1]} : vector<2x8x32xf32> to vector<2x8x8xf32>
    %59 = vector.extract_strided_slice %55 {offsets = [0, 0, 24], sizes = [2, 8, 8], strides = [1, 1, 1]} : vector<2x8x32xf32> to vector<2x8x8xf32>
    %60 = tpu.concatenate %56, %57, %58, %59 in 0 : vector<2x8x8xf32>, vector<2x8x8xf32>, vector<2x8x8xf32>, vector<2x8x8xf32> -> vector<8x8x8xf32>
    %61 = vector.shape_cast %48 : vector<16x32xf32> to vector<2x8x32xf32>
    %62 = vector.extract_strided_slice %61 {offsets = [0, 0, 0], sizes = [2, 8, 8], strides = [1, 1, 1]} : vector<2x8x32xf32> to vector<2x8x8xf32>
    %63 = vector.extract_strided_slice %61 {offsets = [0, 0, 8], sizes = [2, 8, 8], strides = [1, 1, 1]} : vector<2x8x32xf32> to vector<2x8x8xf32>
    %64 = vector.extract_strided_slice %61 {offsets = [0, 0, 16], sizes = [2, 8, 8], strides = [1, 1, 1]} : vector<2x8x32xf32> to vector<2x8x8xf32>
    %65 = vector.extract_strided_slice %61 {offsets = [0, 0, 24], sizes = [2, 8, 8], strides = [1, 1, 1]} : vector<2x8x32xf32> to vector<2x8x8xf32>
    %66 = tpu.concatenate %62, %63, %64, %65 in 0 : vector<2x8x8xf32>, vector<2x8x8xf32>, vector<2x8x8xf32>, vector<2x8x8xf32> -> vector<8x8x8xf32>
    "tpu.trace_start"() <{level = 10 : i32, message = "gqd,gkd->gqk"}> : () -> ()
    %cst_24 = arith.constant dense<0.000000e+00> : vector<8x8x8xf32>
    %67 = tpu.matmul %54, %60, %cst_24 {dimension_numbers = #tpu.dot_dimension_numbers<[2], [2], [1], [1], [0, 0, 0, 1, 1, 1], [0], [0]>} : vector<8x8x8xf32>, vector<8x8x8xf32>, vector<8x8x8xf32> -> vector<8x8x8xf32>
    "tpu.trace_stop"() : () -> ()
    %cst_25 = arith.constant 0.353553385 : f32
    %68 = vector.broadcast %cst_25 : f32 to vector<8x8x8xf32>
    %69 = arith.mulf %67, %68 : vector<8x8x8xf32>
    %cst_26 = arith.constant 0xFF800000 : f32
    %70 = vector.shape_cast %18 : vector<1x8x8xi1> to vector<1x8x8xi1>
    %71 = vector.broadcast %70 : vector<1x8x8xi1> to vector<8x8x8xi1>
    %72 = vector.broadcast %cst_26 : f32 to vector<8x8x8xf32>
    %73 = arith.select %71, %69, %72 : vector<8x8x8xi1>, vector<8x8x8xf32>
    %cst_27 = arith.constant dense<0xFF800000> : vector<8x8xf32>
    %74 = vector.multi_reduction <maximumf>, %73, %cst_27 [2] : vector<8x8x8xf32> to vector<8x8xf32>
    %75 = vector.shape_cast %74 : vector<8x8xf32> to vector<8x8x1xf32>
    %76 = vector.broadcast %75 : vector<8x8x1xf32> to vector<8x8x8xf32>
    %77 = arith.subf %73, %76 : vector<8x8x8xf32>
    %78 = math.exp %77 : vector<8x8x8xf32>
    %cst_28 = arith.constant dense<0.000000e+00> : vector<8x8xf32>
    %79 = vector.multi_reduction <add>, %78, %cst_28 [2] : vector<8x8x8xf32> to vector<8x8xf32>
    %80 = vector.shape_cast %79 : vector<8x8xf32> to vector<8x8x1xf32>
    %81 = tpu.reciprocal %80 {approx = true} : vector<8x8x1xf32> -> vector<8x8x1xf32>
    %82 = vector.broadcast %81 : vector<8x8x1xf32> to vector<8x8x8xf32>
    %83 = arith.mulf %78, %82 : vector<8x8x8xf32>
    "tpu.trace_start"() <{level = 10 : i32, message = "gqk,gkd->gqd"}> : () -> ()
    %cst_29 = arith.constant dense<0.000000e+00> : vector<8x8x8xf32>
    %84 = tpu.matmul %83, %66, %cst_29 {dimension_numbers = #tpu.dot_dimension_numbers<[2], [1], [1], [2], [0, 0, 0, 1, 1, 2], [0], [0]>} : vector<8x8x8xf32>, vector<8x8x8xf32>, vector<8x8x8xf32> -> vector<8x8x8xf32>
    "tpu.trace_stop"() : () -> ()
    %85 = vector.shape_cast %84 : vector<8x8x8xf32> to vector<4x16x8xf32>
    %c0_30 = arith.constant 0 : index
    %c0_31 = arith.constant 0 : index
    %c0_32 = arith.constant 0 : index
    %86 = vector.load %arg7[%c0_30, %c0_31, %c0_32] : memref<4x8x32xf32, #tpu.memory_space<vmem>>, vector<4x8x32xf32>
    "tpu.trace_start"() <{level = 10 : i32, message = "hnd,hdc->hnc"}> : () -> ()
    %cst_33 = arith.constant dense<0.000000e+00> : vector<4x16x32xf32>
    %87 = tpu.matmul %85, %86, %cst_33 {dimension_numbers = #tpu.dot_dimension_numbers<[2], [1], [1], [2], [0, 0, 0, 1, 1, 2], [0], [0]>} : vector<4x16x8xf32>, vector<4x8x32xf32>, vector<4x16x32xf32> -> vector<4x16x32xf32>
    "tpu.trace_stop"() : () -> ()
    %cst_34 = arith.constant dense<0.000000e+00> : vector<16x32xf32>
    %88 = vector.multi_reduction <add>, %87, %cst_34 [0] : vector<4x16x32xf32> to vector<16x32xf32>
    %89 = arith.addf %14, %88 : vector<16x32xf32>
    %c0_35 = arith.constant 0 : index
    %c0_36 = arith.constant 0 : index
    %90 = vector.load %arg8[%c0_35, %c0_36] : memref<1x32xf32, #tpu.memory_space<vmem>>, vector<1x32xf32>
    %91 = vector.broadcast %90 : vector<1x32xf32> to vector<16x32xf32>
    %92 = arith.addf %89, %91 : vector<16x32xf32>
    %c0_37 = arith.constant 0 : index
    %c0_38 = arith.constant 0 : index
    %93 = vector.load %arg11[%c0_37, %c0_38] : memref<1x32xf32, #tpu.memory_space<vmem>>, vector<1x32xf32>
    %c0_39 = arith.constant 0 : index
    %c0_40 = arith.constant 0 : index
    %94 = vector.load %arg12[%c0_39, %c0_40] : memref<1x32xf32, #tpu.memory_space<vmem>>, vector<1x32xf32>
    %cst_41 = arith.constant dense<0.000000e+00> : vector<16xf32>
    %95 = vector.multi_reduction <add>, %92, %cst_41 [1] : vector<16x32xf32> to vector<16xf32>
    %96 = vector.shape_cast %95 : vector<16xf32> to vector<16x1xf32>
    %cst_42 = arith.constant 3.200000e+01 : f32
    %97 = vector.broadcast %cst_42 : f32 to vector<16x1xf32>
    %98 = arith.divf %96, %97 : vector<16x1xf32>
    %99 = vector.broadcast %98 : vector<16x1xf32> to vector<16x32xf32>
    %100 = arith.subf %92, %99 : vector<16x32xf32>
    %101 = arith.mulf %100, %100 : vector<16x32xf32>
    %cst_43 = arith.constant dense<0.000000e+00> : vector<16xf32>
    %102 = vector.multi_reduction <add>, %101, %cst_43 [1] : vector<16x32xf32> to vector<16xf32>
    %103 = vector.shape_cast %102 : vector<16xf32> to vector<16x1xf32>
    %cst_44 = arith.constant 3.200000e+01 : f32
    %104 = vector.broadcast %cst_44 : f32 to vector<16x1xf32>
    %105 = arith.divf %103, %104 : vector<16x1xf32>
    %106 = vector.broadcast %98 : vector<16x1xf32> to vector<16x32xf32>
    %107 = arith.subf %92, %106 : vector<16x32xf32>
    %cst_45 = arith.constant 9.99999974E-6 : f32
    %108 = vector.broadcast %cst_45 : f32 to vector<16x1xf32>
    %109 = arith.addf %105, %108 : vector<16x1xf32>
    %110 = math.rsqrt %109 : vector<16x1xf32>
    %111 = vector.broadcast %110 : vector<16x1xf32> to vector<16x32xf32>
    %112 = arith.mulf %107, %111 : vector<16x32xf32>
    %113 = vector.broadcast %93 : vector<1x32xf32> to vector<16x32xf32>
    %114 = arith.mulf %112, %113 : vector<16x32xf32>
    %115 = vector.broadcast %94 : vector<1x32xf32> to vector<16x32xf32>
    %116 = arith.addf %114, %115 : vector<16x32xf32>
    %c0_46 = arith.constant 0 : index
    %c0_47 = arith.constant 0 : index
    %117 = vector.load %arg13[%c0_46, %c0_47] : memref<32x128xf32, #tpu.memory_space<vmem>>, vector<32x128xf32>
    %cst_48 = arith.constant dense<0.000000e+00> : vector<16x128xf32>
    %118 = tpu.matmul %116, %117, %cst_48 {dimension_numbers = #tpu.dot_dimension_numbers<[1], [0], [0], [1], [0, 0, 1, 1], [], []>} : vector<16x32xf32>, vector<32x128xf32>, vector<16x128xf32> -> vector<16x128xf32>
    %c0_49 = arith.constant 0 : index
    %c0_50 = arith.constant 0 : index
    %119 = vector.load %arg14[%c0_49, %c0_50] : memref<1x128xf32, #tpu.memory_space<vmem>>, vector<1x128xf32>
    %120 = vector.broadcast %119 : vector<1x128xf32> to vector<16x128xf32>
    %121 = arith.addf %118, %120 : vector<16x128xf32>
    %cst_51 = arith.constant 0.000000e+00 : f32
    %122 = vector.broadcast %cst_51 : f32 to vector<16x128xf32>
    %123 = arith.maximumf %121, %122 : vector<16x128xf32>
    %c0_52 = arith.constant 0 : index
    %c0_53 = arith.constant 0 : index
    %124 = vector.load %arg15[%c0_52, %c0_53] : memref<128x32xf32, #tpu.memory_space<vmem>>, vector<128x32xf32>
    %cst_54 = arith.constant dense<0.000000e+00> : vector<16x32xf32>
    %125 = tpu.matmul %123, %124, %cst_54 {dimension_numbers = #tpu.dot_dimension_numbers<[1], [0], [0], [1], [0, 0, 1, 1], [], []>} : vector<16x128xf32>, vector<128x32xf32>, vector<16x32xf32> -> vector<16x32xf32>
    %126 = arith.addf %92, %125 : vector<16x32xf32>
    %c0_55 = arith.constant 0 : index
    %c0_56 = arith.constant 0 : index
    %127 = vector.load %arg16[%c0_55, %c0_56] : memref<1x32xf32, #tpu.memory_space<vmem>>, vector<1x32xf32>
    %128 = vector.broadcast %127 : vector<1x32xf32> to vector<16x32xf32>
    %129 = arith.addf %126, %128 : vector<16x32xf32>
    %c0_57 = arith.constant 0 : index
    %c0_58 = arith.constant 0 : index
    %130 = vector.load %arg22[%c0_57, %c0_58] : memref<1x32xf32, #tpu.memory_space<vmem>>, vector<1x32xf32>
    %c0_59 = arith.constant 0 : index
    %c0_60 = arith.constant 0 : index
    %131 = vector.load %arg23[%c0_59, %c0_60] : memref<1x32xf32, #tpu.memory_space<vmem>>, vector<1x32xf32>
    %cst_61 = arith.constant dense<0.000000e+00> : vector<16xf32>
    %132 = vector.multi_reduction <add>, %129, %cst_61 [1] : vector<16x32xf32> to vector<16xf32>
    %133 = vector.shape_cast %132 : vector<16xf32> to vector<16x1xf32>
    %cst_62 = arith.constant 3.200000e+01 : f32
    %134 = vector.broadcast %cst_62 : f32 to vector<16x1xf32>
    %135 = arith.divf %133, %134 : vector<16x1xf32>
    %136 = vector.broadcast %135 : vector<16x1xf32> to vector<16x32xf32>
    %137 = arith.subf %129, %136 : vector<16x32xf32>
    %138 = arith.mulf %137, %137 : vector<16x32xf32>
    %cst_63 = arith.constant dense<0.000000e+00> : vector<16xf32>
    %139 = vector.multi_reduction <add>, %138, %cst_63 [1] : vector<16x32xf32> to vector<16xf32>
    %140 = vector.shape_cast %139 : vector<16xf32> to vector<16x1xf32>
    %cst_64 = arith.constant 3.200000e+01 : f32
    %141 = vector.broadcast %cst_64 : f32 to vector<16x1xf32>
    %142 = arith.divf %140, %141 : vector<16x1xf32>
    %143 = vector.broadcast %135 : vector<16x1xf32> to vector<16x32xf32>
    %144 = arith.subf %129, %143 : vector<16x32xf32>
    %cst_65 = arith.constant 9.99999974E-6 : f32
    %145 = vector.broadcast %cst_65 : f32 to vector<16x1xf32>
    %146 = arith.addf %142, %145 : vector<16x1xf32>
    %147 = math.rsqrt %146 : vector<16x1xf32>
    %148 = vector.broadcast %147 : vector<16x1xf32> to vector<16x32xf32>
    %149 = arith.mulf %144, %148 : vector<16x32xf32>
    %150 = vector.broadcast %130 : vector<1x32xf32> to vector<16x32xf32>
    %151 = arith.mulf %149, %150 : vector<16x32xf32>
    %152 = vector.broadcast %131 : vector<1x32xf32> to vector<16x32xf32>
    %153 = arith.addf %151, %152 : vector<16x32xf32>
    %c0_66 = arith.constant 0 : index
    %c0_67 = arith.constant 0 : index
    %154 = vector.load %arg17[%c0_66, %c0_67] : memref<32x32xf32, #tpu.memory_space<vmem>>, vector<32x32xf32>
    %cst_68 = arith.constant dense<0.000000e+00> : vector<16x32xf32>
    %155 = tpu.matmul %153, %154, %cst_68 {dimension_numbers = #tpu.dot_dimension_numbers<[1], [0], [0], [1], [0, 0, 1, 1], [], []>} : vector<16x32xf32>, vector<32x32xf32>, vector<16x32xf32> -> vector<16x32xf32>
    %c0_69 = arith.constant 0 : index
    %c0_70 = arith.constant 0 : index
    %156 = vector.load %arg18[%c0_69, %c0_70] : memref<32x32xf32, #tpu.memory_space<vmem>>, vector<32x32xf32>
    %cst_71 = arith.constant dense<0.000000e+00> : vector<16x32xf32>
    %157 = tpu.matmul %153, %156, %cst_71 {dimension_numbers = #tpu.dot_dimension_numbers<[1], [0], [0], [1], [0, 0, 1, 1], [], []>} : vector<16x32xf32>, vector<32x32xf32>, vector<16x32xf32> -> vector<16x32xf32>
    %c0_72 = arith.constant 0 : index
    %c0_73 = arith.constant 0 : index
    %158 = vector.load %arg19[%c0_72, %c0_73] : memref<32x32xf32, #tpu.memory_space<vmem>>, vector<32x32xf32>
    %cst_74 = arith.constant dense<0.000000e+00> : vector<16x32xf32>
    %159 = tpu.matmul %153, %158, %cst_74 {dimension_numbers = #tpu.dot_dimension_numbers<[1], [0], [0], [1], [0, 0, 1, 1], [], []>} : vector<16x32xf32>, vector<32x32xf32>, vector<16x32xf32> -> vector<16x32xf32>
    %160 = vector.shape_cast %155 : vector<16x32xf32> to vector<2x8x32xf32>
    %161 = vector.extract_strided_slice %160 {offsets = [0, 0, 0], sizes = [2, 8, 8], strides = [1, 1, 1]} : vector<2x8x32xf32> to vector<2x8x8xf32>
    %162 = vector.extract_strided_slice %160 {offsets = [0, 0, 8], sizes = [2, 8, 8], strides = [1, 1, 1]} : vector<2x8x32xf32> to vector<2x8x8xf32>
    %163 = vector.extract_strided_slice %160 {offsets = [0, 0, 16], sizes = [2, 8, 8], strides = [1, 1, 1]} : vector<2x8x32xf32> to vector<2x8x8xf32>
    %164 = vector.extract_strided_slice %160 {offsets = [0, 0, 24], sizes = [2, 8, 8], strides = [1, 1, 1]} : vector<2x8x32xf32> to vector<2x8x8xf32>
    %165 = tpu.concatenate %161, %162, %163, %164 in 0 : vector<2x8x8xf32>, vector<2x8x8xf32>, vector<2x8x8xf32>, vector<2x8x8xf32> -> vector<8x8x8xf32>
    %166 = vector.shape_cast %157 : vector<16x32xf32> to vector<2x8x32xf32>
    %167 = vector.extract_strided_slice %166 {offsets = [0, 0, 0], sizes = [2, 8, 8], strides = [1, 1, 1]} : vector<2x8x32xf32> to vector<2x8x8xf32>
    %168 = vector.extract_strided_slice %166 {offsets = [0, 0, 8], sizes = [2, 8, 8], strides = [1, 1, 1]} : vector<2x8x32xf32> to vector<2x8x8xf32>
    %169 = vector.extract_strided_slice %166 {offsets = [0, 0, 16], sizes = [2, 8, 8], strides = [1, 1, 1]} : vector<2x8x32xf32> to vector<2x8x8xf32>
    %170 = vector.extract_strided_slice %166 {offsets = [0, 0, 24], sizes = [2, 8, 8], strides = [1, 1, 1]} : vector<2x8x32xf32> to vector<2x8x8xf32>
    %171 = tpu.concatenate %167, %168, %169, %170 in 0 : vector<2x8x8xf32>, vector<2x8x8xf32>, vector<2x8x8xf32>, vector<2x8x8xf32> -> vector<8x8x8xf32>
    %172 = vector.shape_cast %159 : vector<16x32xf32> to vector<2x8x32xf32>
    %173 = vector.extract_strided_slice %172 {offsets = [0, 0, 0], sizes = [2, 8, 8], strides = [1, 1, 1]} : vector<2x8x32xf32> to vector<2x8x8xf32>
    %174 = vector.extract_strided_slice %172 {offsets = [0, 0, 8], sizes = [2, 8, 8], strides = [1, 1, 1]} : vector<2x8x32xf32> to vector<2x8x8xf32>
    %175 = vector.extract_strided_slice %172 {offsets = [0, 0, 16], sizes = [2, 8, 8], strides = [1, 1, 1]} : vector<2x8x32xf32> to vector<2x8x8xf32>
    %176 = vector.extract_strided_slice %172 {offsets = [0, 0, 24], sizes = [2, 8, 8], strides = [1, 1, 1]} : vector<2x8x32xf32> to vector<2x8x8xf32>
    %177 = tpu.concatenate %173, %174, %175, %176 in 0 : vector<2x8x8xf32>, vector<2x8x8xf32>, vector<2x8x8xf32>, vector<2x8x8xf32> -> vector<8x8x8xf32>
    "tpu.trace_start"() <{level = 10 : i32, message = "gqd,gkd->gqk"}> : () -> ()
    %cst_75 = arith.constant dense<0.000000e+00> : vector<8x8x8xf32>
    %178 = tpu.matmul %165, %171, %cst_75 {dimension_numbers = #tpu.dot_dimension_numbers<[2], [2], [1], [1], [0, 0, 0, 1, 1, 1], [0], [0]>} : vector<8x8x8xf32>, vector<8x8x8xf32>, vector<8x8x8xf32> -> vector<8x8x8xf32>
    "tpu.trace_stop"() : () -> ()
    %cst_76 = arith.constant 0.353553385 : f32
    %179 = vector.broadcast %cst_76 : f32 to vector<8x8x8xf32>
    %180 = arith.mulf %178, %179 : vector<8x8x8xf32>
    %cst_77 = arith.constant 0xFF800000 : f32
    %181 = vector.shape_cast %18 : vector<1x8x8xi1> to vector<1x8x8xi1>
    %182 = vector.broadcast %181 : vector<1x8x8xi1> to vector<8x8x8xi1>
    %183 = vector.broadcast %cst_77 : f32 to vector<8x8x8xf32>
    %184 = arith.select %182, %180, %183 : vector<8x8x8xi1>, vector<8x8x8xf32>
    %cst_78 = arith.constant dense<0xFF800000> : vector<8x8xf32>
    %185 = vector.multi_reduction <maximumf>, %184, %cst_78 [2] : vector<8x8x8xf32> to vector<8x8xf32>
    %186 = vector.shape_cast %185 : vector<8x8xf32> to vector<8x8x1xf32>
    %187 = vector.broadcast %186 : vector<8x8x1xf32> to vector<8x8x8xf32>
    %188 = arith.subf %184, %187 : vector<8x8x8xf32>
    %189 = math.exp %188 : vector<8x8x8xf32>
    %cst_79 = arith.constant dense<0.000000e+00> : vector<8x8xf32>
    %190 = vector.multi_reduction <add>, %189, %cst_79 [2] : vector<8x8x8xf32> to vector<8x8xf32>
    %191 = vector.shape_cast %190 : vector<8x8xf32> to vector<8x8x1xf32>
    %192 = tpu.reciprocal %191 {approx = true} : vector<8x8x1xf32> -> vector<8x8x1xf32>
    %193 = vector.broadcast %192 : vector<8x8x1xf32> to vector<8x8x8xf32>
    %194 = arith.mulf %189, %193 : vector<8x8x8xf32>
    "tpu.trace_start"() <{level = 10 : i32, message = "gqk,gkd->gqd"}> : () -> ()
    %cst_80 = arith.constant dense<0.000000e+00> : vector<8x8x8xf32>
    %195 = tpu.matmul %194, %177, %cst_80 {dimension_numbers = #tpu.dot_dimension_numbers<[2], [1], [1], [2], [0, 0, 0, 1, 1, 2], [0], [0]>} : vector<8x8x8xf32>, vector<8x8x8xf32>, vector<8x8x8xf32> -> vector<8x8x8xf32>
    "tpu.trace_stop"() : () -> ()
    %196 = vector.shape_cast %195 : vector<8x8x8xf32> to vector<4x16x8xf32>
    %c0_81 = arith.constant 0 : index
    %c0_82 = arith.constant 0 : index
    %c0_83 = arith.constant 0 : index
    %197 = vector.load %arg20[%c0_81, %c0_82, %c0_83] : memref<4x8x32xf32, #tpu.memory_space<vmem>>, vector<4x8x32xf32>
    "tpu.trace_start"() <{level = 10 : i32, message = "hnd,hdc->hnc"}> : () -> ()
    %cst_84 = arith.constant dense<0.000000e+00> : vector<4x16x32xf32>
    %198 = tpu.matmul %196, %197, %cst_84 {dimension_numbers = #tpu.dot_dimension_numbers<[2], [1], [1], [2], [0, 0, 0, 1, 1, 2], [0], [0]>} : vector<4x16x8xf32>, vector<4x8x32xf32>, vector<4x16x32xf32> -> vector<4x16x32xf32>
    "tpu.trace_stop"() : () -> ()
    %cst_85 = arith.constant dense<0.000000e+00> : vector<16x32xf32>
    %199 = vector.multi_reduction <add>, %198, %cst_85 [0] : vector<4x16x32xf32> to vector<16x32xf32>
    %200 = arith.addf %129, %199 : vector<16x32xf32>
    %c0_86 = arith.constant 0 : index
    %c0_87 = arith.constant 0 : index
    %201 = vector.load %arg21[%c0_86, %c0_87] : memref<1x32xf32, #tpu.memory_space<vmem>>, vector<1x32xf32>
    %202 = vector.broadcast %201 : vector<1x32xf32> to vector<16x32xf32>
    %203 = arith.addf %200, %202 : vector<16x32xf32>
    %c0_88 = arith.constant 0 : index
    %c0_89 = arith.constant 0 : index
    %204 = vector.load %arg24[%c0_88, %c0_89] : memref<1x32xf32, #tpu.memory_space<vmem>>, vector<1x32xf32>
    %c0_90 = arith.constant 0 : index
    %c0_91 = arith.constant 0 : index
    %205 = vector.load %arg25[%c0_90, %c0_91] : memref<1x32xf32, #tpu.memory_space<vmem>>, vector<1x32xf32>
    %cst_92 = arith.constant dense<0.000000e+00> : vector<16xf32>
    %206 = vector.multi_reduction <add>, %203, %cst_92 [1] : vector<16x32xf32> to vector<16xf32>
    %207 = vector.shape_cast %206 : vector<16xf32> to vector<16x1xf32>
    %cst_93 = arith.constant 3.200000e+01 : f32
    %208 = vector.broadcast %cst_93 : f32 to vector<16x1xf32>
    %209 = arith.divf %207, %208 : vector<16x1xf32>
    %210 = vector.broadcast %209 : vector<16x1xf32> to vector<16x32xf32>
    %211 = arith.subf %203, %210 : vector<16x32xf32>
    %212 = arith.mulf %211, %211 : vector<16x32xf32>
    %cst_94 = arith.constant dense<0.000000e+00> : vector<16xf32>
    %213 = vector.multi_reduction <add>, %212, %cst_94 [1] : vector<16x32xf32> to vector<16xf32>
    %214 = vector.shape_cast %213 : vector<16xf32> to vector<16x1xf32>
    %cst_95 = arith.constant 3.200000e+01 : f32
    %215 = vector.broadcast %cst_95 : f32 to vector<16x1xf32>
    %216 = arith.divf %214, %215 : vector<16x1xf32>
    %217 = vector.broadcast %209 : vector<16x1xf32> to vector<16x32xf32>
    %218 = arith.subf %203, %217 : vector<16x32xf32>
    %cst_96 = arith.constant 9.99999974E-6 : f32
    %219 = vector.broadcast %cst_96 : f32 to vector<16x1xf32>
    %220 = arith.addf %216, %219 : vector<16x1xf32>
    %221 = math.rsqrt %220 : vector<16x1xf32>
    %222 = vector.broadcast %221 : vector<16x1xf32> to vector<16x32xf32>
    %223 = arith.mulf %218, %222 : vector<16x32xf32>
    %224 = vector.broadcast %204 : vector<1x32xf32> to vector<16x32xf32>
    %225 = arith.mulf %223, %224 : vector<16x32xf32>
    %226 = vector.broadcast %205 : vector<1x32xf32> to vector<16x32xf32>
    %227 = arith.addf %225, %226 : vector<16x32xf32>
    %c0_97 = arith.constant 0 : index
    %c0_98 = arith.constant 0 : index
    %228 = vector.load %arg26[%c0_97, %c0_98] : memref<32x128xf32, #tpu.memory_space<vmem>>, vector<32x128xf32>
    %cst_99 = arith.constant dense<0.000000e+00> : vector<16x128xf32>
    %229 = tpu.matmul %227, %228, %cst_99 {dimension_numbers = #tpu.dot_dimension_numbers<[1], [0], [0], [1], [0, 0, 1, 1], [], []>} : vector<16x32xf32>, vector<32x128xf32>, vector<16x128xf32> -> vector<16x128xf32>
    %c0_100 = arith.constant 0 : index
    %c0_101 = arith.constant 0 : index
    %230 = vector.load %arg27[%c0_100, %c0_101] : memref<1x128xf32, #tpu.memory_space<vmem>>, vector<1x128xf32>
    %231 = vector.broadcast %230 : vector<1x128xf32> to vector<16x128xf32>
    %232 = arith.addf %229, %231 : vector<16x128xf32>
    %cst_102 = arith.constant 0.000000e+00 : f32
    %233 = vector.broadcast %cst_102 : f32 to vector<16x128xf32>
    %234 = arith.maximumf %232, %233 : vector<16x128xf32>
    %c0_103 = arith.constant 0 : index
    %c0_104 = arith.constant 0 : index
    %235 = vector.load %arg28[%c0_103, %c0_104] : memref<128x32xf32, #tpu.memory_space<vmem>>, vector<128x32xf32>
    %cst_105 = arith.constant dense<0.000000e+00> : vector<16x32xf32>
    %236 = tpu.matmul %234, %235, %cst_105 {dimension_numbers = #tpu.dot_dimension_numbers<[1], [0], [0], [1], [0, 0, 1, 1], [], []>} : vector<16x128xf32>, vector<128x32xf32>, vector<16x32xf32> -> vector<16x32xf32>
    %237 = arith.addf %203, %236 : vector<16x32xf32>
    %c0_106 = arith.constant 0 : index
    %c0_107 = arith.constant 0 : index
    %238 = vector.load %arg29[%c0_106, %c0_107] : memref<1x32xf32, #tpu.memory_space<vmem>>, vector<1x32xf32>
    %239 = vector.broadcast %238 : vector<1x32xf32> to vector<16x32xf32>
    %240 = arith.addf %237, %239 : vector<16x32xf32>
    %c0_108 = arith.constant 0 : index
    %c0_109 = arith.constant 0 : index
    %241 = vector.load %arg30[%c0_108, %c0_109] : memref<1x32xf32, #tpu.memory_space<vmem>>, vector<1x32xf32>
    %c0_110 = arith.constant 0 : index
    %c0_111 = arith.constant 0 : index
    %242 = vector.load %arg31[%c0_110, %c0_111] : memref<1x32xf32, #tpu.memory_space<vmem>>, vector<1x32xf32>
    %cst_112 = arith.constant dense<0.000000e+00> : vector<16xf32>
    %243 = vector.multi_reduction <add>, %240, %cst_112 [1] : vector<16x32xf32> to vector<16xf32>
    %244 = vector.shape_cast %243 : vector<16xf32> to vector<16x1xf32>
    %cst_113 = arith.constant 3.200000e+01 : f32
    %245 = vector.broadcast %cst_113 : f32 to vector<16x1xf32>
    %246 = arith.divf %244, %245 : vector<16x1xf32>
    %247 = vector.broadcast %246 : vector<16x1xf32> to vector<16x32xf32>
    %248 = arith.subf %240, %247 : vector<16x32xf32>
    %249 = arith.mulf %248, %248 : vector<16x32xf32>
    %cst_114 = arith.constant dense<0.000000e+00> : vector<16xf32>
    %250 = vector.multi_reduction <add>, %249, %cst_114 [1] : vector<16x32xf32> to vector<16xf32>
    %251 = vector.shape_cast %250 : vector<16xf32> to vector<16x1xf32>
    %cst_115 = arith.constant 3.200000e+01 : f32
    %252 = vector.broadcast %cst_115 : f32 to vector<16x1xf32>
    %253 = arith.divf %251, %252 : vector<16x1xf32>
    %254 = vector.broadcast %246 : vector<16x1xf32> to vector<16x32xf32>
    %255 = arith.subf %240, %254 : vector<16x32xf32>
    %cst_116 = arith.constant 9.99999974E-6 : f32
    %256 = vector.broadcast %cst_116 : f32 to vector<16x1xf32>
    %257 = arith.addf %253, %256 : vector<16x1xf32>
    %258 = math.rsqrt %257 : vector<16x1xf32>
    %259 = vector.broadcast %258 : vector<16x1xf32> to vector<16x32xf32>
    %260 = arith.mulf %255, %259 : vector<16x32xf32>
    %261 = vector.broadcast %241 : vector<1x32xf32> to vector<16x32xf32>
    %262 = arith.mulf %260, %261 : vector<16x32xf32>
    %263 = vector.broadcast %242 : vector<1x32xf32> to vector<16x32xf32>
    %264 = arith.addf %262, %263 : vector<16x32xf32>
    %c0_117 = arith.constant 0 : index
    %c0_118 = arith.constant 0 : index
    %265 = vector.load %arg32[%c0_117, %c0_118] : memref<32x128xf32, #tpu.memory_space<vmem>>, vector<32x128xf32>
    %cst_119 = arith.constant dense<0.000000e+00> : vector<16x128xf32>
    %266 = tpu.matmul %264, %265, %cst_119 {dimension_numbers = #tpu.dot_dimension_numbers<[1], [0], [0], [1], [0, 0, 1, 1], [], []>} : vector<16x32xf32>, vector<32x128xf32>, vector<16x128xf32> -> vector<16x128xf32>
    %c0_120 = arith.constant 0 : index
    %c0_121 = arith.constant 0 : index
    %267 = vector.load %arg33[%c0_120, %c0_121] : memref<1x128xf32, #tpu.memory_space<vmem>>, vector<1x128xf32>
    %268 = vector.broadcast %267 : vector<1x128xf32> to vector<16x128xf32>
    %269 = arith.addf %266, %268 : vector<16x128xf32>
    %270 = vector.shape_cast %269 : vector<16x128xf32> to vector<2x8x128xf32>
    %c0_122 = arith.constant 0 : index
    %c0_123 = arith.constant 0 : index
    %c0_124 = arith.constant 0 : index
    %271 = vector.load %arg34[%c0_122, %c0_123, %c0_124] : memref<2x8x128xf32, #tpu.memory_space<vmem>>, vector<2x8x128xf32>
    tpu.vector_store %arg34[%c0_122, %c0_123, %c0_124], %270 {strides = array<i32>} : memref<2x8x128xf32, #tpu.memory_space<vmem>>, vector<2x8x128xf32>,
    return
  }
  func.func @transform_0(%arg0: i32) -> (i32, i32, i32) {
    %c0_i32 = arith.constant 0 : i32
    %c0_i32_0 = arith.constant 0 : i32
    %c0_i32_1 = arith.constant 0 : i32
    return %arg0, %c0_i32, %c0_i32_0 : i32, i32, i32
  }
  func.func @transform_1(%arg0: i32) -> (i32, i32) {
    %c0_i32 = arith.constant 0 : i32
    %c0_i32_0 = arith.constant 0 : i32
    %c0_i32_1 = arith.constant 0 : i32
    return %c0_i32, %c0_i32_0 : i32, i32
  }
  func.func @transform_2(%arg0: i32) -> (i32, i32) {
    %c0_i32 = arith.constant 0 : i32
    %c0_i32_0 = arith.constant 0 : i32
    %c0_i32_1 = arith.constant 0 : i32
    return %c0_i32, %c0_i32_0 : i32, i32
  }
  func.func @transform_3(%arg0: i32) -> (i32, i32) {
    %c0_i32 = arith.constant 0 : i32
    %c0_i32_0 = arith.constant 0 : i32
    %c0_i32_1 = arith.constant 0 : i32
    return %c0_i32, %c0_i32_0 : i32, i32
  }
  func.func @transform_4(%arg0: i32) -> (i32, i32) {
    %c0_i32 = arith.constant 0 : i32
    %c0_i32_0 = arith.constant 0 : i32
    %c0_i32_1 = arith.constant 0 : i32
    return %c0_i32, %c0_i32_0 : i32, i32
  }
  func.func @transform_5(%arg0: i32) -> (i32, i32) {
    %c0_i32 = arith.constant 0 : i32
    %c0_i32_0 = arith.constant 0 : i32
    %c0_i32_1 = arith.constant 0 : i32
    return %c0_i32, %c0_i32_0 : i32, i32
  }
  func.func @transform_6(%arg0: i32) -> (i32, i32, i32) {
    %c0_i32 = arith.constant 0 : i32
    %c0_i32_0 = arith.constant 0 : i32
    %c0_i32_1 = arith.constant 0 : i32
    %c0_i32_2 = arith.constant 0 : i32
    return %c0_i32, %c0_i32_0, %c0_i32_1 : i32, i32, i32
  }
  func.func @transform_7(%arg0: i32) -> (i32, i32) {
    %c0_i32 = arith.constant 0 : i32
    %c0_i32_0 = arith.constant 0 : i32
    %c0_i32_1 = arith.constant 0 : i32
    return %c0_i32, %c0_i32_0 : i32, i32
  }
  func.func @transform_8(%arg0: i32) -> (i32, i32) {
    %c0_i32 = arith.constant 0 : i32
    %c0_i32_0 = arith.constant 0 : i32
    %c0_i32_1 = arith.constant 0 : i32
    return %c0_i32, %c0_i32_0 : i32, i32
  }
  func.func @transform_9(%arg0: i32) -> (i32, i32) {
    %c0_i32 = arith.constant 0 : i32
    %c0_i32_0 = arith.constant 0 : i32
    %c0_i32_1 = arith.constant 0 : i32
    return %c0_i32, %c0_i32_0 : i32, i32
  }
  func.func @transform_10(%arg0: i32) -> (i32, i32) {
    %c0_i32 = arith.constant 0 : i32
    %c0_i32_0 = arith.constant 0 : i32
    %c0_i32_1 = arith.constant 0 : i32
    return %c0_i32, %c0_i32_0 : i32, i32
  }
  func.func @transform_11(%arg0: i32) -> (i32, i32) {
    %c0_i32 = arith.constant 0 : i32
    %c0_i32_0 = arith.constant 0 : i32
    %c0_i32_1 = arith.constant 0 : i32
    return %c0_i32, %c0_i32_0 : i32, i32
  }
  func.func @transform_12(%arg0: i32) -> (i32, i32) {
    %c0_i32 = arith.constant 0 : i32
    %c0_i32_0 = arith.constant 0 : i32
    %c0_i32_1 = arith.constant 0 : i32
    return %c0_i32, %c0_i32_0 : i32, i32
  }
  func.func @transform_13(%arg0: i32) -> (i32, i32) {
    %c0_i32 = arith.constant 0 : i32
    %c0_i32_0 = arith.constant 0 : i32
    %c0_i32_1 = arith.constant 0 : i32
    return %c0_i32, %c0_i32_0 : i32, i32
  }
  func.func @transform_14(%arg0: i32) -> (i32, i32) {
    %c0_i32 = arith.constant 0 : i32
    %c0_i32_0 = arith.constant 0 : i32
    %c0_i32_1 = arith.constant 0 : i32
    return %c0_i32, %c0_i32_0 : i32, i32
  }
  func.func @transform_15(%arg0: i32) -> (i32, i32) {
    %c0_i32 = arith.constant 0 : i32
    %c0_i32_0 = arith.constant 0 : i32
    %c0_i32_1 = arith.constant 0 : i32
    return %c0_i32, %c0_i32_0 : i32, i32
  }
  func.func @transform_16(%arg0: i32) -> (i32, i32) {
    %c0_i32 = arith.constant 0 : i32
    %c0_i32_0 = arith.constant 0 : i32
    %c0_i32_1 = arith.constant 0 : i32
    return %c0_i32, %c0_i32_0 : i32, i32
  }
  func.func @transform_17(%arg0: i32) -> (i32, i32) {
    %c0_i32 = arith.constant 0 : i32
    %c0_i32_0 = arith.constant 0 : i32
    %c0_i32_1 = arith.constant 0 : i32
    return %c0_i32, %c0_i32_0 : i32, i32
  }
  func.func @transform_18(%arg0: i32) -> (i32, i32) {
    %c0_i32 = arith.constant 0 : i32
    %c0_i32_0 = arith.constant 0 : i32
    %c0_i32_1 = arith.constant 0 : i32
    return %c0_i32, %c0_i32_0 : i32, i32
  }
  func.func @transform_19(%arg0: i32) -> (i32, i32, i32) {
    %c0_i32 = arith.constant 0 : i32
    %c0_i32_0 = arith.constant 0 : i32
    %c0_i32_1 = arith.constant 0 : i32
    %c0_i32_2 = arith.constant 0 : i32
    return %c0_i32, %c0_i32_0, %c0_i32_1 : i32, i32, i32
  }
  func.func @transform_20(%arg0: i32) -> (i32, i32) {
    %c0_i32 = arith.constant 0 : i32
    %c0_i32_0 = arith.constant 0 : i32
    %c0_i32_1 = arith.constant 0 : i32
    return %c0_i32, %c0_i32_0 : i32, i32
  }
  func.func @transform_21(%arg0: i32) -> (i32, i32) {
    %c0_i32 = arith.constant 0 : i32
    %c0_i32_0 = arith.constant 0 : i32
    %c0_i32_1 = arith.constant 0 : i32
    return %c0_i32, %c0_i32_0 : i32, i32
  }
  func.func @transform_22(%arg0: i32) -> (i32, i32) {
    %c0_i32 = arith.constant 0 : i32
    %c0_i32_0 = arith.constant 0 : i32
    %c0_i32_1 = arith.constant 0 : i32
    return %c0_i32, %c0_i32_0 : i32, i32
  }
  func.func @transform_23(%arg0: i32) -> (i32, i32) {
    %c0_i32 = arith.constant 0 : i32
    %c0_i32_0 = arith.constant 0 : i32
    %c0_i32_1 = arith.constant 0 : i32
    return %c0_i32, %c0_i32_0 : i32, i32
  }
  func.func @transform_24(%arg0: i32) -> (i32, i32) {
    %c0_i32 = arith.constant 0 : i32
    %c0_i32_0 = arith.constant 0 : i32
    %c0_i32_1 = arith.constant 0 : i32
    return %c0_i32, %c0_i32_0 : i32, i32
  }
  func.func @transform_25(%arg0: i32) -> (i32, i32) {
    %c0_i32 = arith.constant 0 : i32
    %c0_i32_0 = arith.constant 0 : i32
    %c0_i32_1 = arith.constant 0 : i32
    return %c0_i32, %c0_i32_0 : i32, i32
  }
  func.func @transform_26(%arg0: i32) -> (i32, i32) {
    %c0_i32 = arith.constant 0 : i32
    %c0_i32_0 = arith.constant 0 : i32
    %c0_i32_1 = arith.constant 0 : i32
    return %c0_i32, %c0_i32_0 : i32, i32
  }
  func.func @transform_27(%arg0: i32) -> (i32, i32) {
    %c0_i32 = arith.constant 0 : i32
    %c0_i32_0 = arith.constant 0 : i32
    %c0_i32_1 = arith.constant 0 : i32
    return %c0_i32, %c0_i32_0 : i32, i32
  }
  func.func @transform_28(%arg0: i32) -> (i32, i32) {
    %c0_i32 = arith.constant 0 : i32
    %c0_i32_0 = arith.constant 0 : i32
    %c0_i32_1 = arith.constant 0 : i32
    return %c0_i32, %c0_i32_0 : i32, i32
  }
  func.func @transform_29(%arg0: i32) -> (i32, i32) {
    %c0_i32 = arith.constant 0 : i32
    %c0_i32_0 = arith.constant 0 : i32
    %c0_i32_1 = arith.constant 0 : i32
    return %c0_i32, %c0_i32_0 : i32, i32
  }
  func.func @transform_30(%arg0: i32) -> (i32, i32) {
    %c0_i32 = arith.constant 0 : i32
    %c0_i32_0 = arith.constant 0 : i32
    %c0_i32_1 = arith.constant 0 : i32
    return %c0_i32, %c0_i32_0 : i32, i32
  }
  func.func @transform_31(%arg0: i32) -> (i32, i32) {
    %c0_i32 = arith.constant 0 : i32
    %c0_i32_0 = arith.constant 0 : i32
    %c0_i32_1 = arith.constant 0 : i32
    return %c0_i32, %c0_i32_0 : i32, i32
  }
  func.func @transform_32(%arg0: i32) -> (i32, i32) {
    %c0_i32 = arith.constant 0 : i32
    %c0_i32_0 = arith.constant 0 : i32
    %c0_i32_1 = arith.constant 0 : i32
    return %c0_i32, %c0_i32_0 : i32, i32
  }
  func.func @transform_33(%arg0: i32) -> (i32, i32, i32) {
    %c0_i32 = arith.constant 0 : i32
    %c0_i32_0 = arith.constant 0 : i32
    %c0_i32_1 = arith.constant 0 : i32
    return %arg0, %c0_i32, %c0_i32_0 : i32, i32, i32
  }
}

</mosaic_0001>

<bundles_post_ra>
// kernel: tpu_custom_call.1
= control target key start
LH: loop header
LB: loop body
LE: loop exit
PB: predicated region body
PF: predicated region fallthrough
CT: control target
= control target key end

     0   :  { %s5713_s6 = smov 1   ;;  %s5714_s10 = smov 2   ;;  %s6469_s0 = inlined_call_operand.smem [shape: u32[34], index: -1, kind: input, shape index: {}] }
   0x1   :  { %s5764_s5 = sld [smem:[%s6469_s0]]   ;;  %s5715_s14 = smov 3  }
   0x2   :  { %s5769_s9 = sld [smem:[%s6469_s0 + %s5713_s6]]   ;;  %s5716_s18 = smov 4  }
   0x3   :  { %s5774_s13 = sld [smem:[%s6469_s0 + %s5714_s10]]   ;;  %s5717_s22 = smov 5  }
   0x4   :  { %s5779_s17 = sld [smem:[%s6469_s0 + %s5715_s14]]   ;;  %s5718_s26 = smov 6  }
   0x5   :  { %s5784_s21 = sld [smem:[%s6469_s0 + %s5716_s18]]   ;;  %s5719_s30 = smov 7  }
   0x6   :  { %s5789_s25 = sld [smem:[%s6469_s0 + %s5717_s22]]   ;;  %s5720_s4 = smov 8  }
   0x7   :  { %s5794_s29 = sld [smem:[%s6469_s0 + %s5718_s26]]   ;;  %s5721_s10 = smov 9  }
   0x8   :  { %s5799_s3 = sld [smem:[%s6469_s0 + %s5719_s30]]   ;;  %s5722_s15 = smov 10  }
   0x9   :  { %s5804_s8 = sld [smem:[%s6469_s0 + %s5720_s4]]   ;;  %s5723_s20 = smov 11  }
   0xa   :  { %s5809_s14 = sld [smem:[%s6469_s0 + %s5721_s10]]   ;;  %s5724_s26 = smov 12  }
   0xb   :  { %s5814_s19 = sld [smem:[%s6469_s0 + %s5722_s15]]   ;;  %s5725_s1 = smov 13  }
   0xc   :  { %s5819_s24 = sld [smem:[%s6469_s0 + %s5723_s20]]   ;;  %s5726_s7 = smov 14  }
   0xd   :  { %s5824_s30 = sld [smem:[%s6469_s0 + %s5724_s26]]   ;;  %s5727_s15 = smov 15  }
   0xe   :  { %s5829_s6 = sld [smem:[%s6469_s0 + %s5725_s1]]   ;;  %s5728_s22 = smov 16  }
   0xf   :  { %s5834_s12 = sld [smem:[%s6469_s0 + %s5726_s7]]   ;;  %s5729_s28 = smov 17  }
  0x10   :  { %s5839_s20 = sld [smem:[%s6469_s0 + %s5727_s15]]   ;;  %s5730_s7 = smov 18  }
  0x11   :  { %s5844_s27 = sld [smem:[%s6469_s0 + %s5728_s22]]   ;;  %s5731_s15 = smov 19  }
  0x12   :  { %s5849_s4 = sld [smem:[%s6469_s0 + %s5729_s28]]   ;;  %s5732_s22 = smov 20  }
  0x13   :  { %s5733_s28 = smov 21  }
  0x14   :  { %6476 = sst [smem:[#allocation5_spill]] %s5829_s6 }
  0x15   :  { %s5854_s6 = sld [smem:[%s6469_s0 + %s5730_s7]]   ;;  %s5734_s7 = smov 22  }
  0x16   :  { %6477 = sst [smem:[#allocation6_spill]] %s5839_s20 }
  0x17   :  { %6478 = sst [smem:[#allocation7_spill]] %s5844_s27 }
  0x18   :  { %6479 = sst [smem:[#allocation8_spill]] %s5849_s4 }
  0x19   :  { %s5859_s20 = sld [smem:[%s6469_s0 + %s5731_s15]]   ;;  %s5735_s15 = smov 23  }
  0x1a   :  { %s5864_s27 = sld [smem:[%s6469_s0 + %s5732_s22]]   ;;  %s5736_s22 = smov 24  }
  0x1b   :  { %6480 = sst [smem:[#allocation9_spill]] %s5854_s6 }
  0x1c   :  { %s5869_s4 = sld [smem:[%s6469_s0 + %s5733_s28]]   ;;  %s5737_s28 = smov 25  }
  0x1d   :  { %s5874_s6 = sld [smem:[%s6469_s0 + %s5734_s7]]   ;;  %s5738_s7 = smov 26  }
  0x1f   :  { %6481 = sst [smem:[#allocation10_spill]] %s5859_s20 }
  0x20   :  { %6482 = sst [smem:[#allocation11_spill]] %s5864_s27 }
  0x21   :  { %s5879_s20 = sld [smem:[%s6469_s0 + %s5735_s15]]   ;;  %s5739_s15 = smov 27  }
  0x22   :  { %6483 = sst [smem:[#allocation12_spill]] %s5869_s4 }
  0x23   :  { %6484 = sst [smem:[#allocation13_spill]] %s5874_s6 }
  0x24   :  { %s5884_s27 = sld [smem:[%s6469_s0 + %s5736_s22]]   ;;  %s5740_s22 = smov 28  }
  0x25   :  { %s5889_s4 = sld [smem:[%s6469_s0 + %s5737_s28]]   ;;  %s5741_s28 = smov 29  }
  0x26   :  { %s5894_s6 = sld [smem:[%s6469_s0 + %s5738_s7]]   ;;  %s5742_s7 = smov 30  }
  0x27   :  { %6485 = sst [smem:[#allocation14_spill]] %s5879_s20 }
  0x28   :  { %s5899_s20 = sld [smem:[%s6469_s0 + %s5739_s15]]   ;;  %s5743_s15 = smov 31  }
  0x2a   :  { %6486 = sst [smem:[#allocation15_spill]] %s5884_s27 }
  0x2b   :  { %6487 = sst [smem:[#allocation16_spill]] %s5889_s4 }
  0x2c   :  { %6488 = sst [smem:[#allocation17_spill]] %s5894_s6 }
  0x2d   :  { %s5904_s27 = sld [smem:[%s6469_s0 + %s5740_s22]]   ;;  %s5744_s22 = smov 32  }
  0x2e   :  { %6489 = sst [smem:[#allocation18_spill]] %s5899_s20 }
  0x2f   :  { %s5909_s4 = sld [smem:[%s6469_s0 + %s5741_s28]]   ;;  %s5745_s28 = smov 33  }
  0x30   :  { %s5914_s6 = sld [smem:[%s6469_s0 + %s5742_s7]]  }
  0x31   :  { %s5919_s20 = sld [smem:[%s6469_s0 + %s5743_s15]]  }
  0x33   :  { %6490 = sst [smem:[#allocation19_spill]] %s5904_s27 }
  0x34   :  { %s5924_s27 = sld [smem:[%s6469_s0 + %s5744_s22]]  }
  0x35   :  { %6491 = sst [smem:[#allocation20_spill]] %s5909_s4 }
  0x36   :  { %s5929_s4 = sld [smem:[%s6469_s0 + %s5745_s28]]  }
  0x37   :  { %v139_v0 = vld [vmem:[%s5764_s5] sm:$0xff]  ;;  %v170_v1 = vld [vmem:[%s5769_s9 + $0x78] sm:$0xff]  ;;  %v5746_v2 = vmov 0   ;;  %v169_v3 = vld [vmem:[%s5769_s9 + $0x70] sm:$0xff] }
  0x38   :  { %5606 = vset.pattern.permute.xlu0 %v5746_v2  ;;  %5159 = vmatprep.subr.mxu0 %v170_v1  ;;  %v168_v4 = vld [vmem:[%s5769_s9 + $0x68] sm:$0xff]  ;;  %v167_v6 = vld [vmem:[%s5769_s9 + $0x60] sm:$0xff]  ;;  %v166_v7 = vld [vmem:[%s5769_s9 + $0x58] sm:$0xff] }
  0x39   :  { %144 = vperm.xlu0 %5606, %v139_v0   ;;  %5160 = vmatpush3.msra.mxu0 %v170_v1  ;;  %v140_v5 = vld [vmem:[%s5764_s5 + $0x8] sm:$0xff] }
  0x3a   :  { %5161 = vmatprep.subr.mxu0 %v169_v3 }
  0x3b   :  { %5162 = vmatpush3.msra.mxu0 %v169_v3 }
  0x3c   :  { %5163 = vmatprep.subr.mxu0 %v168_v4 }
  0x3d   :  { %147 = vperm.xlu0 %5606, %v140_v5   ;;  %5164 = vmatpush3.msra.mxu0 %v168_v4 }
  0x3e   :  { %72 = vsyncpa [#allocation3], 0  ;;  %5165 = vmatprep.subr.mxu0 %v167_v6  ;;  %v165_v8 = vld [vmem:[%s5769_s9 + $0x50] sm:$0xff]  ;;  %v164_v9 = vld [vmem:[%s5769_s9 + $0x48] sm:$0xff]  ;;  %v141_v19 = vlaneseq  ;;  %v5747_v22 = vmov 1.0   ;;  %vm254_vm2 = vcmask 261120  }
  0x3f   :  { %5166 = vmatpush3.msra.mxu0 %v167_v6  ;;  %v163_v10 = vld [vmem:[%s5769_s9 + $0x40] sm:$0xff]  ;;  %v162_v11 = vld [vmem:[%s5769_s9 + $0x38] sm:$0xff]  ;;  %v161_v12 = vld [vmem:[%s5769_s9 + $0x30] sm:$0xff]  ;;  %v5748_v5 = vmov 0.0   ;;  %vm5749_vm3 = vmmov 0   ;;  %vm589_vm4 = vcmask 64512  }
  0x40   :  { %5167 = vmatprep.subr.mxu0 %v166_v7  ;;  %v160_v13 = vld [vmem:[%s5769_s9 + $0x28] sm:$0xff]  ;;  %v159_v14 = vld [vmem:[%s5769_s9 + $0x20] sm:$0xff]  ;;  %v158_v15 = vld [vmem:[%s5769_s9 + $0x18] sm:$0xff]  ;;  %v5950_v20 = vand.u32 127, %v141_v19  ;;  %s5750_s0 = smov 120   ;;  %s5751_s5 = smov 112  }
  0x41   :  { %5168 = vmatpush3.msra.mxu0 %v166_v7  ;;  %v157_v16 = vld [vmem:[%s5769_s9 + $0x10] sm:$0xff]  ;;  %v156_v17 = vld [vmem:[%s5769_s9 + $0x8] sm:$0xff]  ;;  %v155_v18 = vld [vmem:[%s5769_s9] sm:$0xff]  ;;  %s5752_s9 = smov 104   ;;  %s6506_s7 = sld [smem:[#allocation15_spill]] }
  0x42   :  { %5169 = vmatprep.subr.mxu0 %v165_v8  ;;  %v246_v25 = vld [vmem:[%s5774_s13] sm:$0xff]  ;;  %v386_v41 = vld [vmem:[%s5784_s21 + $0x18] sm:$0xff]  ;;  %v385_v43 = vld [vmem:[%s5784_s21 + $0x10] sm:$0xff]  ;;  %s6494_s13 = sld [smem:[#allocation5_spill]] }
  0x43   :  { %5170 = vmatpush3.msra.mxu0 %v165_v8  ;;  %v301_v42 = vld [vmem:[%s5779_s17 + $0x18] sm:$0xff]  ;;  %5205 = vmatprep.subr.mxu1 %v386_v41  ;;  %v300_v44 = vld [vmem:[%s5779_s17 + $0x10] sm:$0xff]  ;;  %v384_v45 = vld [vmem:[%s5784_s21 + $0x8] sm:$0xff]  ;;  %s6507_s10 = sld [smem:[#allocation17_spill]] }
  0x44   :  { %5171 = vmatprep.subr.mxu0 %v164_v9  ;;  %5206 = vmatpush3.msra.mxu1 %v386_v41  ;;  %v299_v46 = vld [vmem:[%s5779_s17 + $0x8] sm:$0xff]  ;;  %v383_v47 = vld [vmem:[%s5784_s21] sm:$0xff]  ;;  %v465_v49 = vld [vmem:[%s5789_s25 + $0x18] sm:$0xff]  ;;  %s6496_s21 = sld [smem:[#allocation7_spill]] }
  0x45   :  { %5172 = vmatpush3.msra.mxu0 %v164_v9  ;;  %5207 = vmatprep.subr.mxu1 %v385_v43  ;;  %v298_v48 = vld [vmem:[%s5779_s17] sm:$0xff]  ;;  %v464_v2 = vld [vmem:[%s5789_s25 + $0x10] sm:$0xff]  ;;  %v463_v3 = vld [vmem:[%s5789_s25 + $0x8] sm:$0xff]  ;;  %s6495_s17 = sld [smem:[#allocation6_spill]] }
  0x46   :  { %5173 = vmatprep.subr.mxu0 %v163_v10  ;;  %5208 = vmatpush3.msra.mxu1 %v385_v43  ;;  %v4864_v57 = vld [vmem:[%s5804_s8] ss:$0 sm:$0xff]  ;;  %s6500_s8 = sld [smem:[#allocation9_spill]] }
  0x47   :  { %5174 = vmatpush3.msra.mxu0 %v163_v10  ;;  %5209 = vmatprep.subr.mxu1 %v384_v45  ;;  %v4865_v59 = vld [vmem:[%s5809_s14] ss:$0 sm:$0xff]  ;;  %s6501_s14 = sld [smem:[#allocation10_spill]] }
  0x48   :  { %5175 = vmatprep.subr.mxu0 %v162_v11  ;;  %5210 = vmatpush3.msra.mxu1 %v384_v45  ;;  %v462_v4 = vld [vmem:[%s5789_s25] sm:$0xff]  ;;  %s6497_s25 = sld [smem:[#allocation8_spill]] }
  0x49   :  { %5176 = vmatpush3.msra.mxu0 %v162_v11  ;;  %5211 = vmatprep.subr.mxu1 %v383_v47  ;;  %s6508_s11 = sld [smem:[#allocation19_spill]] }
  0x4a   :  { %5177 = vmatprep.subr.mxu0 %v161_v12  ;;  %5212 = vmatpush3.msra.mxu1 %v383_v47  ;;  %s6509_s15 = sld [smem:[#allocation20_spill]] }
  0x4b   :  { %5178 = vmatpush3.msra.mxu0 %v161_v12  ;;  %5216 = vmatprep.subr.mxu1 %v465_v49 }
  0x4c   :  { %5179 = vmatprep.subr.mxu0 %v160_v13 }
  0x4d   :  { %5180 = vmatpush3.msra.mxu0 %v160_v13 }
  0x4e   :  { %5181 = vmatprep.subr.mxu0 %v159_v14 }
  0x4f   :  { %5182 = vmatpush3.msra.mxu0 %v159_v14 }
  0x50   :  { %5183 = vmatprep.subr.mxu0 %v158_v15 }
  0x51   :  { %5184 = vmatpush3.msra.mxu0 %v158_v15 }
  0x52   :  { %5185 = vmatprep.subr.mxu0 %v157_v16 }
  0x53   :  { %5186 = vmatpush3.msra.mxu0 %v157_v16 }
  0x54   :  { %5187 = vmatprep.subr.mxu0 %v156_v17 }
  0x55   :  { %5188 = vmatpush3.msra.mxu0 %v156_v17 }
  0x56   :  { %5189 = vmatprep.subr.mxu0 %v155_v18 }
  0x57   :  { %5190 = vmatpush3.msra.mxu0 %v155_v18 }
  0x58   :  { %5194 = vmatprep.subr.mxu0 %v301_v42 }
  0xb4   :  { %v145_v21 = vpop.permute.xlu0 %144 }
  0xb5   :  { %vm149_vm0 = vcmp.eq.s32.totalorder %v145_v21, %v5950_v20 }
  0xb6   :  { %5191 = vmatprep.mubr.msk.f32.mxu0 %vm149_vm0, %v5747_v22 }
  0xb8   :  { %v148_v23 = vpop.permute.xlu0 %147 }
  0xb9   :  { %vm150_vm1 = vcmp.eq.s32.totalorder %v148_v23, %v5950_v20 }
  0xba   :  { %5192 = vmatmul.mubr.msk.f32.vlgmr.msra.gmra.mxu0 %vm150_vm1, %v5747_v22 }
  0xbb   :  { %5195 = vmatpush3.msra.mxu0 %v301_v42 }
  0xbc   :  { %5196 = vmatprep.subr.mxu0 %v300_v44 }
  0xbd   :  { %5197 = vmatpush3.msra.mxu0 %v300_v44 }
  0xbe   :  { %5198 = vmatprep.subr.mxu0 %v299_v46 }
  0xbf   :  { %5199 = vmatpush3.msra.mxu0 %v299_v46 }
  0xc0   :  { %5200 = vmatprep.subr.mxu0 %v298_v48 }
  0xc1   :  { %5201 = vmatpush3.msra.mxu0 %v298_v48 }
  0xc2   :  { %5237 = vmatprep.subr.mxu0 %v5748_v5 }
 0x17a   :  { %v5193_v24 = vpop.f32.mrf.mxu0 }
 0x17b   :  { %v5957_v28 = vadd.f32 %v5193_v24, %v246_v25 }
 0x17c   :  { %v237_v26 = vpop.f32.mrf.mxu0 }
 0x17d   :  { %v5955_v27 = vadd.f32 %v246_v25, %v237_v26  ;;  %v258_v30 = vsel %vm254_vm2, %v5957_v28, 0.0  ;;  %v250_v26 = vshrl.u32 %v141_v19, 7 }
 0x17f   :  { %v255_v29 = vsel %vm254_vm2, %v5955_v27, 0.0  ;;  %vm6055_vm5 = vcmp.ge.s32.totalorder %v250_v26, %v5950_v20 }
 0x180   :  { %256 = vadd.xlane.f32.xlu1 %v255_v29 }
 0x184   :  { %259 = vadd.xlane.f32.xlu1 %v258_v30 }
 0x209   :  { %v257_v31 = vpop.xlane.xlu1 %256 }
 0x20a   :  { %v262_v32 = vmul.f32 0.03125, %v257_v31 }
 0x20c   :  { %v264_v33 = vsub.f32 %v5955_v27, %v262_v32 }
 0x20d   :  { %v260_v34 = vpop.xlane.xlu1 %259 }
 0x20e   :  { %v263_v35 = vmul.f32 0.03125, %v260_v34  ;;  %v266_v36 = vmul.f32 %v264_v33, %v264_v33 }
 0x210   :  { %v265_v37 = vsub.f32 %v5957_v28, %v263_v35  ;;  %v268_v38 = vsel %vm254_vm2, %v266_v36, 0.0 }
 0x211   :  { %269 = vadd.xlane.f32.xlu0 %v268_v38 }
 0x212   :  { %v267_v39 = vmul.f32 %v265_v37, %v265_v37 }
 0x214   :  { %v271_v40 = vsel %vm254_vm2, %v267_v39, 0.0 }
 0x215   :  { %272 = vadd.xlane.f32.xlu1 %v271_v40 }
 0x29a   :  { %v270_v50 = vpop.xlane.xlu0 %269 }
 0x29b   :  { %v274_v51 = vmul.f32 0.03125, %v270_v50 }
 0x29d   :  { %v276_v52 = vadd.f32 1e-05, %v274_v51 }
 0x29e   :  { %v273_v53 = vpop.xlane.xlu1 %272 }
 0x29f   :  { %5607 = vrsqrt.f32 %v276_v52  ;;  %v275_v54 = vmul.f32 0.03125, %v273_v53 }
 0x2a1   :  { %v277_v55 = vadd.f32 1e-05, %v275_v54 }
 0x2a3   :  { %5609 = vrsqrt.f32 %v277_v55 }
 0x2ac   :  { %v5608_v56 = vpop.eup %5607 }
 0x2ad   :  { %v280_v58 = vmul.f32 %v5608_v56, %v264_v33 }
 0x2af   :  { %v288_v60 = vmul.f32 %v4864_v57, %v280_v58 }
 0x2b0   :  { %v5610_v61 = vpop.eup %5609 }
 0x2b1   :  { %v281_v62 = vmul.f32 %v5610_v61, %v265_v37  ;;  %v296_v63 = vadd.f32 %v4865_v59, %v288_v60 }
 0x2b3   :  { %v289_v0 = vmul.f32 %v4864_v57, %v281_v62  ;;  %5202 = vmatprep.mubr.msk.f32.mxu0 %vm254_vm2, %v296_v63  ;;  %5213 = vmatprep.mubr.msk.f32.mxu1 %vm254_vm2, %v296_v63 }
 0x2b5   :  { %v297_v1 = vadd.f32 %v4865_v59, %v289_v0 }
 0x2b7   :  { %5203 = vmatmul.mubr.msk.f32.vlgmr.msra.gmra.mxu0 %vm254_vm2, %v297_v1  ;;  %5214 = vmatmul.mubr.msk.f32.vlgmr.msra.gmra.mxu1 %vm254_vm2, %v297_v1 }
 0x2b8   :  { %5217 = vmatpush3.msra.mxu1 %v465_v49  ;;  %5224 = vmatprep.mubr.msk.f32.mxu1 %vm254_vm2, %v296_v63 }
 0x2b9   :  { %5218 = vmatprep.subr.mxu1 %v464_v2  ;;  %5239 = vmatprep.mubr.msk.f32.mxu0 %vm5749_vm3, %v5748_v5 }
 0x2ba   :  { %5219 = vmatpush3.msra.mxu1 %v464_v2 }
 0x2bb   :  { %5220 = vmatprep.subr.mxu1 %v463_v3 }
 0x2bc   :  { %5221 = vmatpush3.msra.mxu1 %v463_v3 }
 0x2bd   :  { %5222 = vmatprep.subr.mxu1 %v462_v4 }
 0x2be   :  { %5223 = vmatpush3.msra.mxu1 %v462_v4 }
 0x2bf   :  { %5225 = vmatmul.mubr.msk.f32.vlgmr.msra.gmra.mxu1 %vm254_vm2, %v297_v1  ;;  %5227 = vmatprep.subr.mxu1 %v5748_v5 }
 0x2c0   :  { %5229 = vmatprep.mubr.msk.f32.mxu1 %vm5749_vm3, %v5748_v5 }
 0x377   :  { %v5215_v6 = vpop.f32.mrf.mxu1  ;;  %v5204_v7 = vpop.f32.mrf.mxu0 }
 0x378   :  { %559 = vrot.lane.b32.xlu1 %v5215_v6, %s5750_s0 }
 0x379   :  { %v453_v8 = vpop.f32.mrf.mxu1  ;;  %v374_v9 = vpop.f32.mrf.mxu0 }
 0x37a   :  { %561 = vrot.lane.b32.xlu0 %v453_v8, %s5751_s5  ;;  %5228 = vmatpush3.xpose.msk.msra.mxu1 %vm589_vm4, %v453_v8 }
 0x37b   :  { %5232 = vmatprep.subr.mxu1 %v5748_v5 }
 0x37c   :  { %545 = vrot.lane.b32.xlu1 %v5204_v7, %s5750_s0 }
 0x37d   :  { %5230 = vmatmul.mubr.msk.f32.vlgmr.msra.gmra.mxu1 %vm589_vm4, %v374_v9 }
 0x37e   :  { %551 = vrot.lane.b32.xlu0 %v374_v9, %s5752_s9  ;;  %5233 = vmatpush3.xpose.msk.msra.mxu1 %vm589_vm4, %v5215_v6 }
 0x37f   :  { %5234 = vmatprep.mubr.msk.f32.mxu1 %vm5749_vm3, %v5748_v5  ;;  %5242 = vmatprep.subr.mxu1 %v5748_v5  ;;  %v6037_v21 = vpop.f32.mrf.mxu1 }
 0x380   :  { %557 = vrot.lane.b32.xlu1 %v453_v8, %s5750_s0 }
 0x381   :  { %5235 = vmatmul.mubr.msk.f32.vlgmr.msra.gmra.mxu1 %vm589_vm4, %v5204_v7  ;;  %v6041_v24 = vpop.f32.mrf.mxu1 }
 0x382   :  { %5244 = vmatprep.mubr.msk.f32.mxu1 %vm5749_vm3, %v5748_v5 }
 0x384   :  { %543 = vrot.lane.b32.xlu1 %v374_v9, %s5750_s0 }
 0x388   :  { %563 = vrot.lane.b32.xlu1 %v5215_v6, %s5751_s5 }
 0x38c   :  { %549 = vrot.lane.b32.xlu1 %v5204_v7, %s5751_s5 }
 0x390   :  { %567 = vrot.lane.b32.xlu1 %v5215_v6, %s5752_s9 }
 0x394   :  { %547 = vrot.lane.b32.xlu1 %v374_v9, %s5751_s5 }
 0x398   :  { %565 = vrot.lane.b32.xlu1 %v453_v8, %s5752_s9 }
 0x39c   :  { %553 = vrot.lane.b32.xlu1 %v5204_v7, %s5752_s9 }
 0x3ea   :  { %v560_v10 = vpop.permute.xlu1 %559 }
 0x3eb   :  { %5243 = vmatpush3.xpose.msk.msra.mxu1 %vm589_vm4, %v560_v10 }
 0x3ec   :  { %5252 = vmatprep.subr.mxu1 %v5748_v5  ;;  %v562_v14 = vpop.permute.xlu0 %561 }
 0x3ee   :  { %v546_v11 = vpop.permute.xlu1 %545 }
 0x3ef   :  { %5245 = vmatmul.mubr.msk.f32.vlgmr.msra.gmra.mxu1 %vm589_vm4, %v546_v11 }
 0x3f0   :  { %5254 = vmatprep.mubr.msk.f32.mxu1 %vm5749_vm3, %v5748_v5  ;;  %v552_v23 = vpop.permute.xlu0 %551 }
 0x3f2   :  { %v558_v12 = vpop.permute.xlu1 %557 }
 0x3f3   :  { %5238 = vmatpush3.xpose.msk.msra.mxu0 %vm589_vm4, %v558_v12 }
 0x3f4   :  { %5247 = vmatprep.subr.mxu0 %v5748_v5 }
 0x3f6   :  { %v544_v13 = vpop.permute.xlu1 %543 }
 0x3f7   :  { %5240 = vmatmul.mubr.msk.f32.vlgmr.msra.gmra.mxu0 %vm589_vm4, %v544_v13 }
 0x3f8   :  { %5248 = vmatpush3.xpose.msk.msra.mxu0 %vm589_vm4, %v562_v14  ;;  %5249 = vmatprep.mubr.msk.f32.mxu0 %vm5749_vm3, %v5748_v5 }
 0x3f9   :  { %5257 = vmatprep.subr.mxu0 %v5748_v5 }
 0x3fa   :  { %v564_v15 = vpop.permute.xlu1 %563 }
 0x3fb   :  { %5253 = vmatpush3.xpose.msk.msra.mxu1 %vm589_vm4, %v564_v15 }
 0x3fc   :  { %5262 = vmatprep.subr.mxu1 %v5748_v5 }
 0x3fe   :  { %v550_v16 = vpop.permute.xlu1 %549 }
 0x3ff   :  { %5255 = vmatmul.mubr.msk.f32.vlgmr.msra.gmra.mxu1 %vm589_vm4, %v550_v16 }
 0x400   :  { %5264 = vmatprep.mubr.msk.f32.mxu1 %vm5749_vm3, %v5748_v5 }
 0x402   :  { %v568_v17 = vpop.permute.xlu1 %567 }
 0x403   :  { %5263 = vmatpush3.xpose.msk.msra.mxu1 %vm589_vm4, %v568_v17 }
 0x404   :  { %5272 = vmatprep.subr.mxu1 %v5748_v5 }
 0x406   :  { %v548_v18 = vpop.permute.xlu1 %547 }
 0x407   :  { %5250 = vmatmul.mubr.msk.f32.vlgmr.msra.gmra.mxu0 %vm589_vm4, %v548_v18 }
 0x408   :  { %5259 = vmatprep.mubr.msk.f32.mxu0 %vm5749_vm3, %v5748_v5 }
 0x40a   :  { %v566_v22 = vpop.permute.xlu1 %565 }
 0x40b   :  { %5258 = vmatpush3.xpose.msk.msra.mxu0 %vm589_vm4, %v566_v22 }
 0x40c   :  { %5267 = vmatprep.subr.mxu0 %v5748_v5 }
 0x40e   :  { %5260 = vmatmul.mubr.msk.f32.vlgmr.msra.gmra.mxu0 %vm589_vm4, %v552_v23  ;;  %v554_v25 = vpop.permute.xlu1 %553 }
 0x40f   :  { %5265 = vmatmul.mubr.msk.f32.vlgmr.msra.gmra.mxu1 %vm589_vm4, %v554_v25  ;;  %5268 = vmatpush3.msra.mxu0 %v6041_v24 }
 0x410   :  { %5273 = vmatpush3.msra.mxu1 %v6037_v21  ;;  %5274 = vmatprep.mubr.msk.f32.mxu1 %vm5749_vm3, %v5748_v5 }
 0x411   :  { %5282 = vmatprep.subr.mxu1 %v5748_v5  ;;  %5269 = vmatprep.mubr.msk.f32.mxu0 %vm5749_vm3, %v5748_v5 }
 0x412   :  { %5277 = vmatprep.subr.mxu0 %v5748_v5 }
 0x43d   :  { %v660_v30 = vpop.f32.mrf.mxu1 }
 0x43e   :  { %v1182_v31 = vmul.f32 0.35355338, %v660_v30 }
 0x43f   :  { %v5231_v32 = vpop.f32.mrf.mxu1 }
 0x440   :  { %v1192_v33 = vsel %vm6055_vm5, %v1182_v31, -inf }
 0x441   :  { %v734_v34 = vpop.f32.mrf.mxu1  ;;  %v1200_v35 = vsel %vm589_vm4, %v1192_v33, -inf }
 0x442   :  { %v1183_v36 = vmul.f32 0.35355338, %v734_v34  ;;  %1201 = vmax.xlane.f32.xlu0 %v1200_v35 }
 0x443   :  { %v5236_v37 = vpop.f32.mrf.mxu1 }
 0x444   :  { %v1193_v19 = vsel %vm6055_vm5, %v1183_v36, -inf }
 0x445   :  { %v1203_v20 = vsel %vm589_vm4, %v1193_v19, -inf }
 0x446   :  { %1204 = vmax.xlane.f32.xlu1 %v1203_v20 }
 0x4af   :  { %v882_v38 = vpop.f32.mrf.mxu1 }
 0x4b0   :  { %v1185_v41 = vmul.f32 0.35355338, %v882_v38 }
 0x4b1   :  { %v5246_v39 = vpop.f32.mrf.mxu1 }
 0x4b2   :  { %v1195_v46 = vsel %vm6055_vm5, %v1185_v41, -inf }
 0x4b3   :  { %v1209_v48 = vsel %vm589_vm4, %v1195_v46, -inf }
 0x4b7   :  { %v808_v40 = vpop.f32.mrf.mxu0 }
 0x4b8   :  { %v1184_v42 = vmul.f32 0.35355338, %v808_v40 }
 0x4b9   :  { %v5241_v43 = vpop.f32.mrf.mxu0 }
 0x4ba   :  { %v1194_v44 = vsel %vm6055_vm5, %v1184_v42, -inf }
 0x4bb   :  { %v1206_v45 = vsel %vm589_vm4, %v1194_v44, -inf }
 0x4bc   :  { %1207 = vmax.xlane.f32.xlu0 %v1206_v45 }
 0x4bf   :  { %v1030_v47 = vpop.f32.mrf.mxu1 }
 0x4c0   :  { %v1187_v49 = vmul.f32 0.35355338, %v1030_v47  ;;  %1210 = vmax.xlane.f32.xlu0 %v1209_v48 }
 0x4c1   :  { %v5256_v50 = vpop.f32.mrf.mxu1 }
 0x4c2   :  { %v1197_v51 = vsel %vm6055_vm5, %v1187_v49, -inf }
 0x4c3   :  { %v1215_v52 = vsel %vm589_vm4, %v1197_v51, -inf }
 0x4c4   :  { %1216 = vmax.xlane.f32.xlu0 %v1215_v52 }
 0x4c7   :  { %v956_v53 = vpop.f32.mrf.mxu0 }
 0x4c8   :  { %v1186_v54 = vmul.f32 0.35355338, %v956_v53 }
 0x4c9   :  { %v5251_v55 = vpop.f32.mrf.mxu0 }
 0x4ca   :  { %v1196_v56 = vsel %vm6055_vm5, %v1186_v54, -inf }
 0x4cb   :  { %v1212_v57 = vsel %vm589_vm4, %v1196_v56, -inf  ;;  %v1202_v7 = vpop.xlane.xlu0 %1201 }
 0x4cc   :  { %1213 = vmax.xlane.f32.xlu1 %v1212_v57  ;;  %v1224_v9 = vsub.f32 %v1192_v33, %v1202_v7 }
 0x4ce   :  { %v1104_v58 = vpop.f32.mrf.mxu0  ;;  %v1232_v10 = vmul.f32 1.442695, %v1224_v9 }
 0x4cf   :  { %v1188_v59 = vmul.f32 0.35355338, %v1104_v58  ;;  %v1178_v60 = vpop.f32.mrf.mxu1  ;;  %v1205_v4 = vpop.xlane.xlu1 %1204 }
 0x4d0   :  { %v1189_v61 = vmul.f32 0.35355338, %v1178_v60  ;;  %v5261_v62 = vpop.f32.mrf.mxu0  ;;  %v1225_v6 = vsub.f32 %v1193_v19, %v1205_v4 }
 0x4d1   :  { %v5266_v63 = vpop.f32.mrf.mxu1  ;;  %v1198_v0 = vsel %vm6055_vm5, %v1188_v59, -inf }
 0x4d2   :  { %v1218_v1 = vsel %vm589_vm4, %v1198_v0, -inf  ;;  %v1199_v2 = vsel %vm6055_vm5, %v1189_v61, -inf  ;;  %v1234_v8 = vmul.f32 1.442695, %v1225_v6 }
 0x4d3   :  { %1219 = vmax.xlane.f32.xlu1 %v1218_v1  ;;  %v1221_v3 = vsel %vm589_vm4, %v1199_v2, -inf }
 0x4d4   :  { %1222 = vmax.xlane.f32.xlu0 %v1221_v3  ;;  %5611 = vpow2.f32 %v1234_v8 }
 0x4d5   :  { %5613 = vpow2.f32 %v1232_v10  ;;  %v1872_v10 = vld [vmem:[%s5794_s29] sm:$0xff] }
 0x4e1   :  { %v5612_v11 = vpop.eup %5611 }
 0x4e2   :  { %v1251_v12 = vsel %vm589_vm4, %v5612_v11, 0.0  ;;  %v5614_v13 = vpop.eup %5613 }
 0x4e3   :  { %v1248_v14 = vsel %vm589_vm4, %v5614_v13, 0.0 }
 0x4e4   :  { %571 = vrot.lane.b32.xlu1 %v6041_v24, %s5750_s0 }
 0x4e8   :  { %577 = vrot.lane.b32.xlu1 %v6041_v24, %s5751_s5 }
 0x4ea   :  { %573 = vrot.lane.b32.xlu0 %v6037_v21, %s5750_s0 }
 0x4ec   :  { %579 = vrot.lane.b32.xlu1 %v6037_v21, %s5751_s5 }
 0x509   :  { %1252 = vadd.xlane.f32.xlu0 %v1251_v12 }
 0x510   :  { %1249 = vadd.xlane.f32.xlu1 %v1248_v14 }
 0x545   :  { %v1208_v15 = vpop.xlane.xlu0 %1207 }
 0x546   :  { %v1226_v16 = vsub.f32 %v1194_v44, %v1208_v15 }
 0x548   :  { %v1236_v17 = vmul.f32 1.442695, %v1226_v16  ;;  %v1873_v16 = vld [vmem:[%s5794_s29 + $0x8] sm:$0xff] }
 0x549   :  { %v1211_v18 = vpop.xlane.xlu0 %1210 }
 0x54a   :  { %5615 = vpow2.f32 %v1236_v17  ;;  %v1227_v22 = vsub.f32 %v1195_v46, %v1211_v18  ;;  %v1874_v17 = vld [vmem:[%s5794_s29 + $0x10] sm:$0xff]  ;;  %v1875_v18 = vld [vmem:[%s5794_s29 + $0x18] sm:$0xff]  ;;  %s6498_s29 = sld [smem:[#allocation12_spill]] }
 0x54c   :  { %v1238_v23 = vmul.f32 1.442695, %v1227_v22 }
 0x54d   :  { %v1217_v25 = vpop.xlane.xlu0 %1216 }
 0x54e   :  { %5617 = vpow2.f32 %v1238_v23  ;;  %v1229_v26 = vsub.f32 %v1197_v51, %v1217_v25 }
 0x550   :  { %v1242_v30 = vmul.f32 1.442695, %v1229_v26 }
 0x552   :  { %5619 = vpow2.f32 %v1242_v30 }
 0x555   :  { %v1214_v31 = vpop.xlane.xlu1 %1213 }
 0x556   :  { %v1228_v32 = vsub.f32 %v1196_v56, %v1214_v31 }
 0x557   :  { %v5616_v33 = vpop.eup %5615 }
 0x558   :  { %v1240_v34 = vmul.f32 1.442695, %v1228_v32  ;;  %v1254_v35 = vsel %vm589_vm4, %v5616_v33, 0.0 }
 0x559   :  { %1255 = vadd.xlane.f32.xlu1 %v1254_v35 }
 0x55a   :  { %5621 = vpow2.f32 %v1240_v34 }
 0x55b   :  { %v5618_v36 = vpop.eup %5617 }
 0x55c   :  { %v1220_v37 = vpop.xlane.xlu1 %1219  ;;  %v1257_v19 = vsel %vm589_vm4, %v5618_v36, 0.0 }
 0x55d   :  { %v1230_v20 = vsub.f32 %v1198_v0, %v1220_v37  ;;  %1258 = vadd.xlane.f32.xlu0 %v1257_v19  ;;  %v1223_v38 = vpop.xlane.xlu0 %1222 }
 0x55e   :  { %v1231_v39 = vsub.f32 %v1199_v2, %v1223_v38 }
 0x55f   :  { %v5620_v40 = vpop.eup %5619  ;;  %v1244_v41 = vmul.f32 1.442695, %v1230_v20 }
 0x560   :  { %v1246_v42 = vmul.f32 1.442695, %v1231_v39  ;;  %v1263_v43 = vsel %vm589_vm4, %v5620_v40, 0.0  ;;  %v572_v50 = vpop.permute.xlu1 %571 }
 0x561   :  { %5623 = vpow2.f32 %v1244_v41  ;;  %1264 = vadd.xlane.f32.xlu0 %v1263_v43  ;;  %v574_v51 = vpop.permute.xlu0 %573 }
 0x562   :  { %5625 = vpow2.f32 %v1246_v42 }
 0x564   :  { %v578_v52 = vpop.permute.xlu1 %577 }
 0x567   :  { %v5622_v44 = vpop.eup %5621 }
 0x568   :  { %v1260_v45 = vsel %vm589_vm4, %v5622_v44, 0.0  ;;  %v580_v54 = vpop.permute.xlu1 %579 }
 0x569   :  { %1261 = vadd.xlane.f32.xlu1 %v1260_v45 }
 0x56e   :  { %v6097_v46 = vpop.eup %5623 }
 0x56f   :  { %v6099_v47 = vpop.eup %5625  ;;  %v1266_v48 = vsel %vm589_vm4, %v6097_v46, 0.0 }
 0x570   :  { %1267 = vadd.xlane.f32.xlu1 %v1266_v48  ;;  %v1269_v49 = vsel %vm589_vm4, %v6099_v47, 0.0 }
 0x571   :  { %1270 = vadd.xlane.f32.xlu0 %v1269_v49 }
 0x581   :  { %585 = vrot.lane.b32.xlu1 %v6037_v21, %s5752_s9 }
 0x587   :  { %583 = vrot.lane.b32.xlu0 %v6041_v24, %s5752_s9 }
 0x592   :  { %v1253_v53 = vpop.xlane.xlu0 %1252 }
 0x593   :  { %5627 = vrcp.f32 %v1253_v53 }
 0x599   :  { %v1250_v55 = vpop.xlane.xlu1 %1249 }
 0x59a   :  { %5629 = vrcp.f32 %v1250_v55 }
 0x5a0   :  { %v5628_v56 = vpop.eup %5627 }
 0x5a1   :  { %v1281_v57 = vmul.f32 %v5628_v56, %v5612_v11 }
 0x5a3   :  { %5275 = vmatmul.mubr.msk.f32.vlgmr.msra.gmra.mxu1 %vm589_vm4, %v1281_v57 }
 0x5a4   :  { %5283 = vmatpush3.msra.mxu1 %v574_v51  ;;  %5284 = vmatprep.mubr.msk.f32.mxu1 %vm5749_vm3, %v5748_v5 }
 0x5a5   :  { %5292 = vmatprep.subr.mxu1 %v5748_v5 }
 0x5a7   :  { %v5630_v21 = vpop.eup %5629 }
 0x5a8   :  { %v1280_v24 = vmul.f32 %v5630_v21, %v5614_v13 }
 0x5aa   :  { %5270 = vmatmul.mubr.msk.f32.vlgmr.msra.gmra.mxu0 %vm589_vm4, %v1280_v24 }
 0x5ab   :  { %5278 = vmatpush3.msra.mxu0 %v572_v50  ;;  %5279 = vmatprep.mubr.msk.f32.mxu0 %vm5749_vm3, %v5748_v5 }
 0x5ac   :  { %5287 = vmatprep.subr.mxu0 %v5748_v5 }
 0x5e2   :  { %v1256_v58 = vpop.xlane.xlu1 %1255 }
 0x5e3   :  { %5631 = vrcp.f32 %v1256_v58 }
 0x5e6   :  { %v1259_v59 = vpop.xlane.xlu0 %1258 }
 0x5e7   :  { %5633 = vrcp.f32 %v1259_v59  ;;  %v4904_v59 = vld [vmem:[%s5799_s3] ss:$0 sm:$0xff]  ;;  %s6499_s3 = sld [smem:[#allocation13_spill]] }
 0x5ea   :  { %v1265_v60 = vpop.xlane.xlu0 %1264 }
 0x5eb   :  { %5635 = vrcp.f32 %v1265_v60 }
 0x5f0   :  { %v5632_v61 = vpop.eup %5631 }
 0x5f1   :  { %v1282_v62 = vmul.f32 %v5632_v61, %v5616_v33 }
 0x5f2   :  { %v1262_v63 = vpop.xlane.xlu1 %1261 }
 0x5f3   :  { %5637 = vrcp.f32 %v1262_v63  ;;  %5280 = vmatmul.mubr.msk.f32.vlgmr.msra.gmra.mxu0 %vm589_vm4, %v1282_v62 }
 0x5f4   :  { %v5634_v0 = vpop.eup %5633  ;;  %5288 = vmatpush3.msra.mxu0 %v578_v52  ;;  %5289 = vmatprep.mubr.msk.f32.mxu0 %vm5749_vm3, %v5748_v5 }
 0x5f5   :  { %v1283_v1 = vmul.f32 %v5634_v0, %v5618_v36  ;;  %5297 = vmatprep.subr.mxu0 %v5748_v5 }
 0x5f7   :  { %5285 = vmatmul.mubr.msk.f32.vlgmr.msra.gmra.mxu1 %vm589_vm4, %v1283_v1 }
 0x5f8   :  { %v5636_v2 = vpop.eup %5635  ;;  %5293 = vmatpush3.msra.mxu1 %v580_v54  ;;  %5294 = vmatprep.mubr.msk.f32.mxu1 %vm5749_vm3, %v5748_v5 }
 0x5f9   :  { %v1268_v3 = vpop.xlane.xlu1 %1267  ;;  %v1285_v4 = vmul.f32 %v5636_v2, %v5620_v40  ;;  %5302 = vmatprep.subr.mxu1 %v5748_v5 }
 0x5fa   :  { %5639 = vrcp.f32 %v1268_v3  ;;  %v1271_v6 = vpop.xlane.xlu0 %1270 }
 0x5fb   :  { %5641 = vrcp.f32 %v1271_v6  ;;  %5295 = vmatmul.mubr.msk.f32.vlgmr.msra.gmra.mxu1 %vm589_vm4, %v1285_v4 }
 0x5fc   :  { %5304 = vmatprep.mubr.msk.f32.mxu1 %vm5749_vm3, %v5748_v5 }
 0x5fd   :  { %v586_v7 = vpop.permute.xlu1 %585 }
 0x5fe   :  { %5303 = vmatpush3.msra.mxu1 %v586_v7  ;;  %v584_v11 = vpop.permute.xlu0 %583 }
 0x5ff   :  { %5312 = vmatprep.subr.mxu1 %v1873_v16 }
 0x600   :  { %v5638_v8 = vpop.eup %5637 }
 0x601   :  { %v1284_v9 = vmul.f32 %v5638_v8, %v5622_v44 }
 0x603   :  { %5290 = vmatmul.mubr.msk.f32.vlgmr.msra.gmra.mxu0 %vm589_vm4, %v1284_v9 }
 0x604   :  { %5298 = vmatpush3.msra.mxu0 %v584_v11  ;;  %5299 = vmatprep.mubr.msk.f32.mxu0 %vm5749_vm3, %v5748_v5 }
 0x605   :  { %5307 = vmatprep.subr.mxu0 %v1872_v10 }
 0x607   :  { %v5640_v12 = vpop.eup %5639 }
 0x608   :  { %v5642_v13 = vpop.eup %5641  ;;  %v1286_v14 = vmul.f32 %v5640_v12, %v6097_v46  ;;  %v2272_v12 = vld [vmem:[%s5824_s30 + $0x18] sm:$0xff] }
 0x609   :  { %v1287_v15 = vmul.f32 %v5642_v13, %v6099_v47  ;;  %v2271_v13 = vld [vmem:[%s5824_s30 + $0x10] sm:$0xff] }
 0x60a   :  { %5300 = vmatmul.mubr.msk.f32.vlgmr.msra.gmra.mxu0 %vm589_vm4, %v1286_v14  ;;  %v2270_v14 = vld [vmem:[%s5824_s30 + $0x8] sm:$0xff] }
 0x60b   :  { %5305 = vmatmul.mubr.msk.f32.vlgmr.msra.gmra.mxu1 %vm589_vm4, %v1287_v15  ;;  %5308 = vmatpush3.msra.mxu0 %v1872_v10  ;;  %v2269_v15 = vld [vmem:[%s5824_s30] sm:$0xff]  ;;  %s6504_s30 = sld [smem:[#allocation18_spill]] }
 0x60c   :  { %5313 = vmatpush3.msra.mxu1 %v1873_v16  ;;  %5317 = vmatprep.subr.mxu0 %v1874_v17  ;;  %v2378_v16 = vld [vmem:[%s5834_s12 + $0x78] sm:$0xff] }
 0x60d   :  { %5322 = vmatprep.subr.mxu1 %v1875_v18 }
 0x663   :  { %v1430_v22 = vpop.f32.mrf.mxu1 }
 0x665   :  { %v5276_v23 = vpop.f32.mrf.mxu1 }
 0x666   :  { %v2374_v23 = vld [vmem:[%s5834_s12 + $0x58] sm:$0xff] }
 0x66a   :  { %v1357_v25 = vpop.f32.mrf.mxu0 }
 0x66b   :  { %5309 = vmatprep.mubr.msk.f32.mxu0 %vm589_vm4, %v1357_v25  ;;  %v2373_v25 = vld [vmem:[%s5834_s12 + $0x50] sm:$0xff] }
 0x66c   :  { %v5271_v26 = vpop.f32.mrf.mxu0  ;;  %5310 = vmatmul.mubr.msk.f32.vlgmr.msra.gmra.mxu0 %vm589_vm4, %v1430_v22  ;;  %v2375_v22 = vld [vmem:[%s5834_s12 + $0x60] sm:$0xff] }
 0x66d   :  { %5318 = vmatpush3.msra.mxu0 %v1874_v17  ;;  %v2377_v17 = vld [vmem:[%s5834_s12 + $0x70] sm:$0xff]  ;;  %v2372_v26 = vld [vmem:[%s5834_s12 + $0x48] sm:$0xff] }
 0x66e   :  { %5327 = vmatprep.subr.mxu0 %v2272_v12 }
 0x6b3   :  { %v1503_v30 = vpop.f32.mrf.mxu0 }
 0x6b4   :  { %5314 = vmatprep.mubr.msk.f32.mxu1 %vm589_vm4, %v1503_v30  ;;  %v2371_v30 = vld [vmem:[%s5834_s12 + $0x40] sm:$0xff] }
 0x6b5   :  { %v5281_v31 = vpop.f32.mrf.mxu0 }
 0x6b6   :  { %v2370_v31 = vld [vmem:[%s5834_s12 + $0x38] sm:$0xff] }
 0x6b7   :  { %v1576_v32 = vpop.f32.mrf.mxu1 }
 0x6b8   :  { %5315 = vmatmul.mubr.msk.f32.vlgmr.msra.gmra.mxu1 %vm589_vm4, %v1576_v32  ;;  %v2369_v32 = vld [vmem:[%s5834_s12 + $0x30] sm:$0xff] }
 0x6b9   :  { %v5286_v33 = vpop.f32.mrf.mxu1  ;;  %5323 = vmatpush3.msra.mxu1 %v1875_v18  ;;  %v2376_v18 = vld [vmem:[%s5834_s12 + $0x68] sm:$0xff] }
 0x6ba   :  { %5338 = vmatprep.subr.mxu1 %v2378_v16  ;;  %v2368_v33 = vld [vmem:[%s5834_s12 + $0x28] sm:$0xff] }
 0x6bb   :  { %v1722_v34 = vpop.f32.mrf.mxu1 }
 0x6bd   :  { %v5296_v35 = vpop.f32.mrf.mxu1 }
 0x6c3   :  { %v1649_v36 = vpop.f32.mrf.mxu0 }
 0x6c4   :  { %5319 = vmatprep.mubr.msk.f32.mxu0 %vm589_vm4, %v1649_v36 }
 0x6c5   :  { %v5291_v37 = vpop.f32.mrf.mxu0  ;;  %5320 = vmatmul.mubr.msk.f32.vlgmr.msra.gmra.mxu0 %vm589_vm4, %v1722_v34  ;;  %v2367_v34 = vld [vmem:[%s5834_s12 + $0x20] sm:$0xff] }
 0x6c6   :  { %5328 = vmatpush3.msra.mxu0 %v2272_v12  ;;  %v2512_v12 = vld [vmem:[%s6496_s21 + $0x18] sm:$0xff] }
 0x6c7   :  { %5329 = vmatprep.subr.mxu0 %v2271_v13 }
 0x6c8   :  { %5330 = vmatpush3.msra.mxu0 %v2271_v13  ;;  %v2511_v13 = vld [vmem:[%s6496_s21 + $0x10] sm:$0xff] }
 0x6c9   :  { %5331 = vmatprep.subr.mxu0 %v2270_v14 }
 0x6ca   :  { %v1795_v19 = vpop.f32.mrf.mxu0  ;;  %5332 = vmatpush3.msra.mxu0 %v2270_v14  ;;  %v2510_v14 = vld [vmem:[%s6496_s21 + $0x8] sm:$0xff] }
 0x6cb   :  { %v1868_v20 = vpop.f32.mrf.mxu1  ;;  %5324 = vmatprep.mubr.msk.f32.mxu1 %vm589_vm4, %v1795_v19  ;;  %5333 = vmatprep.subr.mxu0 %v2269_v15 }
 0x6cc   :  { %v5301_v38 = vpop.f32.mrf.mxu0  ;;  %5325 = vmatmul.mubr.msk.f32.vlgmr.msra.gmra.mxu1 %vm589_vm4, %v1868_v20  ;;  %5334 = vmatpush3.msra.mxu0 %v2269_v15  ;;  %v2509_v15 = vld [vmem:[%s6496_s21] sm:$0xff] }
 0x6cd   :  { %v5306_v39 = vpop.f32.mrf.mxu1  ;;  %5339 = vmatpush3.msra.mxu1 %v2378_v16  ;;  %5373 = vmatprep.subr.mxu0 %v2512_v12  ;;  %v2597_v16 = vld [vmem:[%s6497_s25 + $0x18] sm:$0xff] }
 0x6ce   :  { %5340 = vmatprep.subr.mxu1 %v2377_v17 }
 0x6cf   :  { %5341 = vmatpush3.msra.mxu1 %v2377_v17 }
 0x6d0   :  { %5342 = vmatprep.subr.mxu1 %v2376_v18 }
 0x6d1   :  { %5343 = vmatpush3.msra.mxu1 %v2376_v18 }
 0x6d2   :  { %5344 = vmatprep.subr.mxu1 %v2375_v22 }
 0x6d3   :  { %5345 = vmatpush3.msra.mxu1 %v2375_v22 }
 0x6d4   :  { %5346 = vmatprep.subr.mxu1 %v2374_v23 }
 0x6d5   :  { %5347 = vmatpush3.msra.mxu1 %v2374_v23 }
 0x6d6   :  { %5348 = vmatprep.subr.mxu1 %v2373_v25 }
 0x6d7   :  { %5349 = vmatpush3.msra.mxu1 %v2373_v25 }
 0x6d8   :  { %5350 = vmatprep.subr.mxu1 %v2372_v26 }
 0x6d9   :  { %5351 = vmatpush3.msra.mxu1 %v2372_v26 }
 0x6da   :  { %5352 = vmatprep.subr.mxu1 %v2371_v30 }
 0x6db   :  { %5353 = vmatpush3.msra.mxu1 %v2371_v30 }
 0x6dc   :  { %5354 = vmatprep.subr.mxu1 %v2370_v31 }
 0x6dd   :  { %5355 = vmatpush3.msra.mxu1 %v2370_v31  ;;  %v4911_v31 = vld [vmem:[%s6498_s29] ss:$0 sm:$0xff] }
 0x6de   :  { %5356 = vmatprep.subr.mxu1 %v2369_v32 }
 0x6df   :  { %5357 = vmatpush3.msra.mxu1 %v2369_v32 }
 0x6e0   :  { %5358 = vmatprep.subr.mxu1 %v2368_v33 }
 0x6e1   :  { %5359 = vmatpush3.msra.mxu1 %v2368_v33 }
 0x6e2   :  { %5360 = vmatprep.subr.mxu1 %v2367_v34 }
 0x6e3   :  { %5361 = vmatpush3.msra.mxu1 %v2367_v34 }
 0x72c   :  { %v5311_v40 = vpop.f32.mrf.mxu0 }
 0x72d   :  { %v2207_v47 = vsel %vm254_vm2, %v5311_v40, 0.0  ;;  %v4905_v40 = vld [vmem:[%s5814_s19] ss:$0 sm:$0xff]  ;;  %s6502_s19 = sld [smem:[#allocation11_spill]] }
 0x72e   :  { %v1948_v42 = vpop.f32.mrf.mxu0 }
 0x72f   :  { %v2200_v51 = vsel %vm254_vm2, %v1948_v42, 0.0  ;;  %v4906_v42 = vld [vmem:[%s5819_s24] ss:$0 sm:$0xff]  ;;  %s6503_s24 = sld [smem:[#allocation16_spill]] }
 0x778   :  { %v5316_v41 = vpop.f32.mrf.mxu1 }
 0x779   :  { %v2208_v45 = vsel %vm254_vm2, %v5316_v41, 0.0 }
 0x77a   :  { %v2029_v44 = vpop.f32.mrf.mxu1  ;;  %v2209_v50 = vadd.f32 %v2208_v45, %v2207_v47 }
 0x77b   :  { %v2201_v48 = vsel %vm254_vm2, %v2029_v44, 0.0 }
 0x77c   :  { %v2202_v53 = vadd.f32 %v2201_v48, %v2200_v51  ;;  %v2364_v51 = vld [vmem:[%s5834_s12 + $0x8] sm:$0xff] }
 0x785   :  { %v5321_v43 = vpop.f32.mrf.mxu0 }
 0x786   :  { %v2210_v49 = vsel %vm254_vm2, %v5321_v43, 0.0 }
 0x787   :  { %v2110_v46 = vpop.f32.mrf.mxu0  ;;  %v2211_v54 = vadd.f32 %v2210_v49, %v2209_v50  ;;  %v2366_v49 = vld [vmem:[%s5834_s12 + $0x18] sm:$0xff]  ;;  %v2365_v50 = vld [vmem:[%s5834_s12 + $0x10] sm:$0xff] }
 0x788   :  { %v2203_v52 = vsel %vm254_vm2, %v2110_v46, 0.0  ;;  %5362 = vmatprep.subr.mxu1 %v2366_v49 }
 0x789   :  { %v2204_v57 = vadd.f32 %v2203_v52, %v2202_v53  ;;  %5363 = vmatpush3.msra.mxu1 %v2366_v49  ;;  %v2363_v52 = vld [vmem:[%s5834_s12] sm:$0xff]  ;;  %s6505_s12 = sld [smem:[#allocation14_spill]] }
 0x78a   :  { %5364 = vmatprep.subr.mxu1 %v2365_v50  ;;  %v4907_v53 = vld [vmem:[%s6494_s13] ss:$0 sm:$0xff] }
 0x78b   :  { %5365 = vmatpush3.msra.mxu1 %v2365_v50 }
 0x78c   :  { %v5326_v55 = vpop.f32.mrf.mxu1  ;;  %5366 = vmatprep.subr.mxu1 %v2364_v51 }
 0x78d   :  { %v2212_v56 = vsel %vm254_vm2, %v5326_v55, 0.0  ;;  %5367 = vmatpush3.msra.mxu1 %v2364_v51 }
 0x78e   :  { %v2213_v21 = vadd.f32 %v2212_v56, %v2211_v54  ;;  %v2191_v24 = vpop.f32.mrf.mxu1  ;;  %5368 = vmatprep.subr.mxu1 %v2363_v52 }
 0x78f   :  { %v2205_v58 = vsel %vm254_vm2, %v2191_v24, 0.0  ;;  %5369 = vmatpush3.msra.mxu1 %v2363_v52 }
 0x790   :  { %v2215_v60 = vadd.f32 %v2213_v21, %v5957_v28  ;;  %v2206_v61 = vadd.f32 %v2205_v58, %v2204_v57  ;;  %5411 = vmatprep.subr.mxu1 %v5748_v5 }
 0x792   :  { %v2214_v62 = vadd.f32 %v2206_v61, %v5955_v27  ;;  %v6158_v63 = vadd.f32 %v4904_v59, %v2215_v60 }
 0x794   :  { %v2230_v0 = vsel %vm254_vm2, %v6158_v63, 0.0  ;;  %v6162_v1 = vadd.f32 %v4904_v59, %v2214_v62  ;;  %v4910_v59 = vld [vmem:[%s6495_s17] ss:$0 sm:$0xff] }
 0x795   :  { %2231 = vadd.xlane.f32.xlu1 %v2230_v0 }
 0x796   :  { %v2227_v2 = vsel %vm254_vm2, %v6162_v1, 0.0 }
 0x797   :  { %2228 = vadd.xlane.f32.xlu0 %v2227_v2 }
 0x81e   :  { %v2232_v3 = vpop.xlane.xlu1 %2231 }
 0x81f   :  { %v2234_v28 = vmul.f32 0.03125, %v2232_v3 }
 0x820   :  { %v2229_v4 = vpop.xlane.xlu0 %2228 }
 0x821   :  { %v2233_v6 = vmul.f32 0.03125, %v2229_v4  ;;  %v6167_v27 = vsub.f32 %v6158_v63, %v2234_v28 }
 0x823   :  { %v6170_v7 = vsub.f32 %v6162_v1, %v2233_v6  ;;  %v2238_v10 = vmul.f32 %v6167_v27, %v6167_v27 }
 0x825   :  { %v2237_v8 = vmul.f32 %v6170_v7, %v6170_v7  ;;  %v2242_v11 = vsel %vm254_vm2, %v2238_v10, 0.0 }
 0x827   :  { %v2239_v9 = vsel %vm254_vm2, %v2237_v8, 0.0 }
 0x828   :  { %2240 = vadd.xlane.f32.xlu0 %v2239_v9 }
 0x82c   :  { %2243 = vadd.xlane.f32.xlu0 %v2242_v11 }
 0x8b1   :  { %v2241_v35 = vpop.xlane.xlu0 %2240 }
 0x8b2   :  { %v2245_v36 = vmul.f32 0.03125, %v2241_v35 }
 0x8b4   :  { %v2247_v37 = vadd.f32 1e-05, %v2245_v36  ;;  %v4912_v36 = vld [vmem:[%s6499_s3] ss:$0 sm:$0xff] }
 0x8b5   :  { %v2244_v19 = vpop.xlane.xlu0 %2243 }
 0x8b6   :  { %5643 = vrsqrt.f32 %v2247_v37  ;;  %v2246_v20 = vmul.f32 0.03125, %v2244_v19 }
 0x8b8   :  { %v2248_v38 = vadd.f32 1e-05, %v2246_v20 }
 0x8ba   :  { %5645 = vrsqrt.f32 %v2248_v38  ;;  %v2596_v38 = vld [vmem:[%s6497_s25 + $0x10] sm:$0xff] }
 0x8c3   :  { %v5644_v39 = vpop.eup %5643 }
 0x8c4   :  { %v2251_v41 = vmul.f32 %v5644_v39, %v6170_v7  ;;  %v2595_v39 = vld [vmem:[%s6497_s25 + $0x8] sm:$0xff] }
 0x8c6   :  { %v2259_v43 = vmul.f32 %v4905_v40, %v2251_v41  ;;  %v2676_v41 = vld [vmem:[%s6500_s8 + $0x18] sm:$0xff] }
 0x8c7   :  { %v5646_v44 = vpop.eup %5645 }
 0x8c8   :  { %v2252_v45 = vmul.f32 %v5646_v44, %v6167_v27  ;;  %v2267_v46 = vadd.f32 %v4906_v42, %v2259_v43  ;;  %v2674_v43 = vld [vmem:[%s6500_s8 + $0x8] sm:$0xff]  ;;  %v2673_v44 = vld [vmem:[%s6500_s8] sm:$0xff] }
 0x8ca   :  { %v2260_v47 = vmul.f32 %v4905_v40, %v2252_v45  ;;  %5335 = vmatprep.mubr.msk.f32.mxu0 %vm254_vm2, %v2267_v46  ;;  %v2594_v40 = vld [vmem:[%s6497_s25] sm:$0xff] }
 0x8cc   :  { %v2268_v48 = vadd.f32 %v4906_v42, %v2260_v47  ;;  %v2675_v42 = vld [vmem:[%s6500_s8 + $0x10] sm:$0xff] }
 0x8ce   :  { %5336 = vmatmul.mubr.msk.f32.vlgmr.msra.gmra.mxu0 %vm254_vm2, %v2268_v48 }
 0x8cf   :  { %5374 = vmatpush3.msra.mxu0 %v2512_v12 }
 0x8d0   :  { %5375 = vmatprep.subr.mxu0 %v2511_v13 }
 0x8d1   :  { %5376 = vmatpush3.msra.mxu0 %v2511_v13 }
 0x8d2   :  { %5377 = vmatprep.subr.mxu0 %v2510_v14 }
 0x8d3   :  { %5378 = vmatpush3.msra.mxu0 %v2510_v14 }
 0x8d4   :  { %5379 = vmatprep.subr.mxu0 %v2509_v15 }
 0x8d5   :  { %5380 = vmatpush3.msra.mxu0 %v2509_v15 }
 0x8d6   :  { %5384 = vmatprep.subr.mxu0 %v2597_v16 }
 0x98e   :  { %v5337_v54 = vpop.f32.mrf.mxu0 }
 0x98f   :  { %v2358_v55 = vadd.f32 %v5337_v54, %v4907_v53 }
 0x990   :  { %v2352_v56 = vpop.f32.mrf.mxu0 }
 0x991   :  { %v2353_v57 = vadd.f32 %v4907_v53, %v2352_v56  ;;  %v2362_v24 = vmax.f32 %v2358_v55, 0.0 }
 0x993   :  { %v2361_v21 = vmax.f32 %v2353_v57, 0.0 }
 0x995   :  { %5370 = vmatprep.mubr.f32.mxu1 %v2361_v21 }
 0x996   :  { %5371 = vmatmul.mubr.f32.vlgmr.msra.gmra.mxu1 %v2362_v24 }
 0x997   :  { %5413 = vmatprep.mubr.msk.f32.mxu1 %vm5749_vm3, %v5748_v5 }
 0xa56   :  { %v5372_v58 = vpop.f32.mrf.mxu1 }
 0xa57   :  { %v2455_v60 = vadd.f32 %v5372_v58, %v6158_v63 }
 0xa58   :  { %v2445_v61 = vpop.f32.mrf.mxu1 }
 0xa59   :  { %v6210_v62 = vadd.f32 %v4910_v59, %v2455_v60  ;;  %v2454_v0 = vadd.f32 %v2445_v61, %v6162_v1 }
 0xa5b   :  { %v6213_v2 = vadd.f32 %v4910_v59, %v2454_v0  ;;  %v2470_v3 = vsel %vm254_vm2, %v6210_v62, 0.0 }
 0xa5c   :  { %2471 = vadd.xlane.f32.xlu0 %v2470_v3 }
 0xa5d   :  { %v2467_v28 = vsel %vm254_vm2, %v6213_v2, 0.0 }
 0xa5e   :  { %2468 = vadd.xlane.f32.xlu1 %v2467_v28 }
 0xae5   :  { %v2472_v4 = vpop.xlane.xlu0 %2471 }
 0xae6   :  { %v2474_v63 = vmul.f32 0.03125, %v2472_v4 }
 0xae7   :  { %v2469_v6 = vpop.xlane.xlu1 %2468 }
 0xae8   :  { %v2476_v27 = vsub.f32 %v6210_v62, %v2474_v63  ;;  %v2473_v1 = vmul.f32 0.03125, %v2469_v6 }
 0xaea   :  { %v2475_v7 = vsub.f32 %v6213_v2, %v2473_v1  ;;  %v2478_v8 = vmul.f32 %v2476_v27, %v2476_v27 }
 0xaec   :  { %v2482_v9 = vsel %vm254_vm2, %v2478_v8, 0.0  ;;  %v2477_v10 = vmul.f32 %v2475_v7, %v2475_v7 }
 0xaed   :  { %2483 = vadd.xlane.f32.xlu0 %v2482_v9 }
 0xaee   :  { %v2479_v11 = vsel %vm254_vm2, %v2477_v10, 0.0 }
 0xaef   :  { %2480 = vadd.xlane.f32.xlu1 %v2479_v11 }
 0xb76   :  { %v2484_v17 = vpop.xlane.xlu0 %2483 }
 0xb77   :  { %v2486_v18 = vmul.f32 0.03125, %v2484_v17 }
 0xb78   :  { %v2481_v22 = vpop.xlane.xlu1 %2480 }
 0xb79   :  { %v2488_v23 = vadd.f32 1e-05, %v2486_v18  ;;  %v2485_v25 = vmul.f32 0.03125, %v2481_v22 }
 0xb7b   :  { %5647 = vrsqrt.f32 %v2488_v23  ;;  %v2487_v26 = vadd.f32 1e-05, %v2485_v25 }
 0xb7d   :  { %5649 = vrsqrt.f32 %v2487_v26 }
 0xb88   :  { %v5648_v30 = vpop.eup %5647 }
 0xb89   :  { %v2492_v32 = vmul.f32 %v5648_v30, %v2476_v27 }
 0xb8a   :  { %v5650_v33 = vpop.eup %5649 }
 0xb8b   :  { %v2491_v34 = vmul.f32 %v5650_v33, %v2475_v7  ;;  %v2500_v35 = vmul.f32 %v4911_v31, %v2492_v32 }
 0xb8d   :  { %v2499_v37 = vmul.f32 %v4911_v31, %v2491_v34  ;;  %v2508_v20 = vadd.f32 %v4912_v36, %v2500_v35 }
 0xb8f   :  { %v2507_v19 = vadd.f32 %v4912_v36, %v2499_v37 }
 0xb91   :  { %5381 = vmatprep.mubr.msk.f32.mxu0 %vm254_vm2, %v2507_v19 }
 0xb92   :  { %5382 = vmatmul.mubr.msk.f32.vlgmr.msra.gmra.mxu0 %vm254_vm2, %v2508_v20 }
 0xb93   :  { %5385 = vmatpush3.msra.mxu0 %v2597_v16  ;;  %5392 = vmatprep.mubr.msk.f32.mxu0 %vm254_vm2, %v2507_v19 }
 0xb94   :  { %5386 = vmatprep.subr.mxu0 %v2596_v38 }
 0xb95   :  { %5387 = vmatpush3.msra.mxu0 %v2596_v38 }
 0xb96   :  { %5388 = vmatprep.subr.mxu0 %v2595_v39 }
 0xb97   :  { %5389 = vmatpush3.msra.mxu0 %v2595_v39 }
 0xb98   :  { %5390 = vmatprep.subr.mxu0 %v2594_v40 }
 0xb99   :  { %5391 = vmatpush3.msra.mxu0 %v2594_v40 }
 0xb9a   :  { %5393 = vmatmul.mubr.msk.f32.vlgmr.msra.gmra.mxu0 %vm254_vm2, %v2508_v20  ;;  %5395 = vmatprep.subr.mxu0 %v2676_v41 }
 0xb9b   :  { %5396 = vmatpush3.msra.mxu0 %v2676_v41  ;;  %5403 = vmatprep.mubr.msk.f32.mxu0 %vm254_vm2, %v2507_v19 }
 0xb9c   :  { %5397 = vmatprep.subr.mxu0 %v2675_v42 }
 0xb9d   :  { %5398 = vmatpush3.msra.mxu0 %v2675_v42 }
 0xb9e   :  { %5399 = vmatprep.subr.mxu0 %v2674_v43 }
 0xb9f   :  { %5400 = vmatpush3.msra.mxu0 %v2674_v43 }
 0xba0   :  { %5401 = vmatprep.subr.mxu0 %v2673_v44 }
 0xba1   :  { %5402 = vmatpush3.msra.mxu0 %v2673_v44 }
 0xba2   :  { %5404 = vmatmul.mubr.msk.f32.vlgmr.msra.gmra.mxu0 %vm254_vm2, %v2508_v20  ;;  %5406 = vmatprep.subr.mxu0 %v5748_v5 }
 0xba3   :  { %5408 = vmatprep.mubr.msk.f32.mxu0 %vm5749_vm3, %v5748_v5 }
 0xc52   :  { %v5383_v45 = vpop.f32.mrf.mxu0 }
 0xc53   :  { %2756 = vrot.lane.b32.xlu1 %v5383_v45, %s5750_s0 }
 0xc54   :  { %v2585_v46 = vpop.f32.mrf.mxu0 }
 0xc55   :  { %2758 = vrot.lane.b32.xlu0 %v2585_v46, %s5751_s5 }
 0xc57   :  { %2754 = vrot.lane.b32.xlu1 %v2585_v46, %s5750_s0 }
 0xc5a   :  { %v5394_v47 = vpop.f32.mrf.mxu0 }
 0xc5b   :  { %2770 = vrot.lane.b32.xlu0 %v5394_v47, %s5750_s0  ;;  %5412 = vmatpush3.xpose.msk.msra.mxu1 %vm589_vm4, %v5394_v47 }
 0xc5c   :  { %2774 = vrot.lane.b32.xlu1 %v5394_v47, %s5751_s5  ;;  %v2664_v48 = vpop.f32.mrf.mxu0  ;;  %5421 = vmatprep.subr.mxu1 %v5748_v5 }
 0xc5d   :  { %5407 = vmatpush3.xpose.msk.msra.mxu0 %vm589_vm4, %v2664_v48 }
 0xc5e   :  { %5414 = vmatmul.mubr.msk.f32.vlgmr.msra.gmra.mxu1 %vm589_vm4, %v5383_v45  ;;  %5416 = vmatprep.subr.mxu0 %v5748_v5 }
 0xc5f   :  { %2772 = vrot.lane.b32.xlu0 %v2664_v48, %s5751_s5  ;;  %5423 = vmatprep.mubr.msk.f32.mxu1 %vm5749_vm3, %v5748_v5 }
 0xc60   :  { %2768 = vrot.lane.b32.xlu1 %v2664_v48, %s5750_s0  ;;  %5409 = vmatmul.mubr.msk.f32.vlgmr.msra.gmra.mxu0 %vm589_vm4, %v2585_v46 }
 0xc61   :  { %5418 = vmatprep.mubr.msk.f32.mxu0 %vm5749_vm3, %v5748_v5 }
 0xc62   :  { %v6285_v21 = vpop.f32.mrf.mxu0 }
 0xc63   :  { %2776 = vrot.lane.b32.xlu0 %v2664_v48, %s5752_s9 }
 0xc64   :  { %2760 = vrot.lane.b32.xlu1 %v5383_v45, %s5751_s5  ;;  %v6294_v59 = vpop.f32.mrf.mxu0 }
 0xc67   :  { %2762 = vrot.lane.b32.xlu0 %v2585_v46, %s5752_s9 }
 0xc68   :  { %2778 = vrot.lane.b32.xlu1 %v5394_v47, %s5752_s9 }
 0xc6c   :  { %2764 = vrot.lane.b32.xlu1 %v5383_v45, %s5752_s9 }
 0xcc5   :  { %v2757_v49 = vpop.permute.xlu1 %2756 }
 0xcc7   :  { %v2759_v50 = vpop.permute.xlu0 %2758 }
 0xcc9   :  { %v2755_v51 = vpop.permute.xlu1 %2754 }
 0xccd   :  { %v2771_v52 = vpop.permute.xlu0 %2770 }
 0xcce   :  { %v2775_v53 = vpop.permute.xlu1 %2774  ;;  %5422 = vmatpush3.xpose.msk.msra.mxu1 %vm589_vm4, %v2771_v52 }
 0xccf   :  { %5431 = vmatprep.subr.mxu1 %v5748_v5 }
 0xcd1   :  { %5424 = vmatmul.mubr.msk.f32.vlgmr.msra.gmra.mxu1 %vm589_vm4, %v2757_v49  ;;  %v2773_v54 = vpop.permute.xlu0 %2772 }
 0xcd2   :  { %5432 = vmatpush3.xpose.msk.msra.mxu1 %vm589_vm4, %v2775_v53  ;;  %v2769_v55 = vpop.permute.xlu1 %2768  ;;  %5433 = vmatprep.mubr.msk.f32.mxu1 %vm5749_vm3, %v5748_v5 }
 0xcd3   :  { %5417 = vmatpush3.xpose.msk.msra.mxu0 %vm589_vm4, %v2769_v55  ;;  %5441 = vmatprep.subr.mxu1 %v5748_v5 }
 0xcd4   :  { %5426 = vmatprep.subr.mxu0 %v5748_v5 }
 0xcd5   :  { %v2777_v57 = vpop.permute.xlu0 %2776 }
 0xcd6   :  { %v2761_v56 = vpop.permute.xlu1 %2760  ;;  %5419 = vmatmul.mubr.msk.f32.vlgmr.msra.gmra.mxu0 %vm589_vm4, %v2755_v51 }
 0xcd7   :  { %5427 = vmatpush3.xpose.msk.msra.mxu0 %vm589_vm4, %v2773_v54  ;;  %5434 = vmatmul.mubr.msk.f32.vlgmr.msra.gmra.mxu1 %vm589_vm4, %v2761_v56 }
 0xcd8   :  { %5428 = vmatprep.mubr.msk.f32.mxu0 %vm5749_vm3, %v5748_v5  ;;  %5436 = vmatprep.subr.mxu0 %v5748_v5 }
 0xcd9   :  { %5443 = vmatprep.mubr.msk.f32.mxu1 %vm5749_vm3, %v5748_v5  ;;  %v2763_v58 = vpop.permute.xlu0 %2762 }
 0xcda   :  { %v2779_v24 = vpop.permute.xlu1 %2778  ;;  %5429 = vmatmul.mubr.msk.f32.vlgmr.msra.gmra.mxu0 %vm589_vm4, %v2759_v50 }
 0xcdb   :  { %5437 = vmatpush3.xpose.msk.msra.mxu0 %vm589_vm4, %v2777_v57  ;;  %5442 = vmatpush3.xpose.msk.msra.mxu1 %vm589_vm4, %v2779_v24 }
 0xcdc   :  { %5438 = vmatprep.mubr.msk.f32.mxu0 %vm5749_vm3, %v5748_v5  ;;  %5451 = vmatprep.subr.mxu1 %v5748_v5 }
 0xcdd   :  { %5446 = vmatprep.subr.mxu0 %v5748_v5 }
 0xcde   :  { %v2765_v60 = vpop.permute.xlu1 %2764  ;;  %5439 = vmatmul.mubr.msk.f32.vlgmr.msra.gmra.mxu0 %vm589_vm4, %v2763_v58 }
 0xcdf   :  { %5444 = vmatmul.mubr.msk.f32.vlgmr.msra.gmra.mxu1 %vm589_vm4, %v2765_v60  ;;  %5447 = vmatpush3.msra.mxu0 %v6294_v59 }
 0xce0   :  { %5452 = vmatpush3.msra.mxu1 %v6285_v21  ;;  %5453 = vmatprep.mubr.msk.f32.mxu1 %vm5749_vm3, %v5748_v5 }
 0xce1   :  { %5461 = vmatprep.subr.mxu1 %v5748_v5  ;;  %5448 = vmatprep.mubr.msk.f32.mxu0 %vm5749_vm3, %v5748_v5 }
 0xce2   :  { %5456 = vmatprep.subr.mxu0 %v5748_v5 }
 0xd1e   :  { %v2944_v61 = vpop.f32.mrf.mxu1 }
 0xd1f   :  { %v3393_v0 = vmul.f32 0.35355338, %v2944_v61 }
 0xd20   :  { %v2870_v3 = vpop.f32.mrf.mxu0  ;;  %v5415_v28 = vpop.f32.mrf.mxu1 }
 0xd21   :  { %v3392_v4 = vmul.f32 0.35355338, %v2870_v3  ;;  %v3401_v63 = vsel %vm6055_vm5, %v3393_v0, -inf }
 0xd22   :  { %v5410_v6 = vpop.f32.mrf.mxu0  ;;  %v3411_v27 = vsel %vm589_vm4, %v3401_v63, -inf }
 0xd23   :  { %3412 = vmax.xlane.f32.xlu1 %v3411_v27  ;;  %v3400_v1 = vsel %vm6055_vm5, %v3392_v4, -inf }
 0xd24   :  { %v3408_v7 = vsel %vm589_vm4, %v3400_v1, -inf }
 0xd25   :  { %3409 = vmax.xlane.f32.xlu0 %v3408_v7 }
 0xd91   :  { %v3092_v8 = vpop.f32.mrf.mxu1 }
 0xd92   :  { %v3395_v11 = vmul.f32 0.35355338, %v3092_v8 }
 0xd93   :  { %v5425_v9 = vpop.f32.mrf.mxu1 }
 0xd94   :  { %v3403_v25 = vsel %vm6055_vm5, %v3395_v11, -inf }
 0xd95   :  { %v3417_v32 = vsel %vm589_vm4, %v3403_v25, -inf }
 0xd96   :  { %v3018_v10 = vpop.f32.mrf.mxu0 }
 0xd97   :  { %v3394_v12 = vmul.f32 0.35355338, %v3018_v10  ;;  %v3240_v13 = vpop.f32.mrf.mxu1 }
 0xd98   :  { %v5420_v14 = vpop.f32.mrf.mxu0  ;;  %v3397_v22 = vmul.f32 0.35355338, %v3240_v13 }
 0xd99   :  { %v5435_v15 = vpop.f32.mrf.mxu1  ;;  %v3402_v16 = vsel %vm6055_vm5, %v3394_v12, -inf }
 0xd9a   :  { %v3166_v17 = vpop.f32.mrf.mxu0  ;;  %v3414_v18 = vsel %vm589_vm4, %v3402_v16, -inf  ;;  %v3405_v36 = vsel %vm6055_vm5, %v3397_v22, -inf }
 0xd9b   :  { %v3396_v23 = vmul.f32 0.35355338, %v3166_v17  ;;  %3415 = vmax.xlane.f32.xlu0 %v3414_v18  ;;  %v3423_v39 = vsel %vm589_vm4, %v3405_v36, -inf }
 0xd9c   :  { %v5430_v26 = vpop.f32.mrf.mxu0 }
 0xd9d   :  { %v3404_v30 = vsel %vm6055_vm5, %v3396_v23, -inf }
 0xd9e   :  { %v3314_v31 = vpop.f32.mrf.mxu0  ;;  %v3420_v33 = vsel %vm589_vm4, %v3404_v30, -inf }
 0xd9f   :  { %v3398_v34 = vmul.f32 0.35355338, %v3314_v31  ;;  %v3388_v35 = vpop.f32.mrf.mxu1  ;;  %3418 = vmax.xlane.f32.xlu0 %v3417_v32  ;;  %3421 = vmax.xlane.f32.xlu1 %v3420_v33 }
 0xda0   :  { %v3399_v37 = vmul.f32 0.35355338, %v3388_v35  ;;  %v5440_v19 = vpop.f32.mrf.mxu0 }
 0xda1   :  { %v5445_v20 = vpop.f32.mrf.mxu1  ;;  %v3406_v38 = vsel %vm6055_vm5, %v3398_v34, -inf }
 0xda2   :  { %v3426_v40 = vsel %vm589_vm4, %v3406_v38, -inf  ;;  %v3407_v41 = vsel %vm6055_vm5, %v3399_v37, -inf }
 0xda3   :  { %3424 = vmax.xlane.f32.xlu0 %v3423_v39  ;;  %3427 = vmax.xlane.f32.xlu1 %v3426_v40  ;;  %v3429_v42 = vsel %vm589_vm4, %v3407_v41, -inf }
 0xda7   :  { %3430 = vmax.xlane.f32.xlu0 %v3429_v42 }
 0xdac   :  { %v3413_v43 = vpop.xlane.xlu1 %3412 }
 0xdad   :  { %v3433_v44 = vsub.f32 %v3401_v63, %v3413_v43 }
 0xdae   :  { %v3410_v45 = vpop.xlane.xlu0 %3409 }
 0xdaf   :  { %v3442_v29 = vmul.f32 1.442695, %v3433_v44  ;;  %v3432_v46 = vsub.f32 %v3400_v1, %v3410_v45 }
 0xdb1   :  { %5651 = vpow2.f32 %v3442_v29  ;;  %v3440_v47 = vmul.f32 1.442695, %v3432_v46  ;;  %v4080_v29 = vld [vmem:[%s6501_s14] sm:$0xff] }
 0xdb3   :  { %5653 = vpow2.f32 %v3440_v47 }
 0xdb4   :  { %2782 = vrot.lane.b32.xlu1 %v6294_v59, %s5750_s0 }
 0xdb8   :  { %2788 = vrot.lane.b32.xlu1 %v6294_v59, %s5751_s5 }
 0xdbc   :  { %2790 = vrot.lane.b32.xlu1 %v6285_v21, %s5751_s5 }
 0xdbd   :  { %2784 = vrot.lane.b32.xlu0 %v6285_v21, %s5750_s0 }
 0xdbe   :  { %v5652_v48 = vpop.eup %5651 }
 0xdbf   :  { %v3459_v49 = vsel %vm589_vm4, %v5652_v48, 0.0 }
 0xdc0   :  { %v5654_v50 = vpop.eup %5653 }
 0xdc1   :  { %v3456_v51 = vsel %vm589_vm4, %v5654_v50, 0.0 }
 0xddc   :  { %3460 = vadd.xlane.f32.xlu0 %v3459_v49 }
 0xde0   :  { %3457 = vadd.xlane.f32.xlu1 %v3456_v51 }
 0xe24   :  { %v3416_v52 = vpop.xlane.xlu0 %3415 }
 0xe25   :  { %v3434_v53 = vsub.f32 %v3402_v16, %v3416_v52  ;;  %v4081_v52 = vld [vmem:[%s6501_s14 + $0x8] sm:$0xff] }
 0xe27   :  { %v3444_v54 = vmul.f32 1.442695, %v3434_v53  ;;  %v4082_v53 = vld [vmem:[%s6501_s14 + $0x10] sm:$0xff] }
 0xe28   :  { %v3419_v55 = vpop.xlane.xlu0 %3418  ;;  %v3422_v56 = vpop.xlane.xlu1 %3421 }
 0xe29   :  { %5655 = vpow2.f32 %v3444_v54  ;;  %v3435_v57 = vsub.f32 %v3403_v25, %v3419_v55  ;;  %v3436_v24 = vsub.f32 %v3404_v30, %v3422_v56  ;;  %v4083_v54 = vld [vmem:[%s6501_s14 + $0x18] sm:$0xff] }
 0xe2b   :  { %v3446_v58 = vmul.f32 1.442695, %v3435_v57  ;;  %v3448_v60 = vmul.f32 1.442695, %v3436_v24 }
 0xe2c   :  { %v3425_v61 = vpop.xlane.xlu0 %3424  ;;  %v3428_v0 = vpop.xlane.xlu1 %3427 }
 0xe2d   :  { %5657 = vpow2.f32 %v3446_v58  ;;  %v3437_v3 = vsub.f32 %v3405_v36, %v3425_v61  ;;  %v3438_v28 = vsub.f32 %v3406_v38, %v3428_v0 }
 0xe2e   :  { %5659 = vpow2.f32 %v3448_v60 }
 0xe2f   :  { %v3450_v4 = vmul.f32 1.442695, %v3437_v3  ;;  %v3452_v63 = vmul.f32 1.442695, %v3438_v28 }
 0xe30   :  { %v3431_v6 = vpop.xlane.xlu0 %3430  ;;  %v2783_v22 = vpop.permute.xlu1 %2782 }
 0xe31   :  { %5661 = vpow2.f32 %v3450_v4  ;;  %v3439_v27 = vsub.f32 %v3407_v41, %v3431_v6 }
 0xe32   :  { %5663 = vpow2.f32 %v3452_v63 }
 0xe33   :  { %v3454_v1 = vmul.f32 1.442695, %v3439_v27 }
 0xe34   :  { %v2789_v23 = vpop.permute.xlu1 %2788  ;;  %v2785_v25 = vpop.permute.xlu0 %2784 }
 0xe35   :  { %5665 = vpow2.f32 %v3454_v1 }
 0xe36   :  { %v5656_v7 = vpop.eup %5655 }
 0xe37   :  { %v3462_v8 = vsel %vm589_vm4, %v5656_v7, 0.0 }
 0xe38   :  { %3463 = vadd.xlane.f32.xlu1 %v3462_v8  ;;  %v2791_v26 = vpop.permute.xlu1 %2790 }
 0xe3a   :  { %v5658_v9 = vpop.eup %5657 }
 0xe3b   :  { %v5660_v10 = vpop.eup %5659  ;;  %v3465_v11 = vsel %vm589_vm4, %v5658_v9, 0.0 }
 0xe3c   :  { %3466 = vadd.xlane.f32.xlu0 %v3465_v11  ;;  %v3468_v12 = vsel %vm589_vm4, %v5660_v10, 0.0 }
 0xe3d   :  { %3469 = vadd.xlane.f32.xlu1 %v3468_v12 }
 0xe3e   :  { %v5662_v13 = vpop.eup %5661 }
 0xe3f   :  { %v6343_v14 = vpop.eup %5663  ;;  %v3471_v15 = vsel %vm589_vm4, %v5662_v13, 0.0 }
 0xe40   :  { %3472 = vadd.xlane.f32.xlu0 %v3471_v15  ;;  %v3474_v16 = vsel %vm589_vm4, %v6343_v14, 0.0 }
 0xe41   :  { %3475 = vadd.xlane.f32.xlu1 %v3474_v16 }
 0xe42   :  { %v6348_v17 = vpop.eup %5665 }
 0xe43   :  { %v3477_v18 = vsel %vm589_vm4, %v6348_v17, 0.0 }
 0xe44   :  { %3478 = vadd.xlane.f32.xlu0 %v3477_v18 }
 0xe52   :  { %2796 = vrot.lane.b32.xlu1 %v6285_v21, %s5752_s9 }
 0xe5a   :  { %2794 = vrot.lane.b32.xlu0 %v6294_v59, %s5752_s9 }
 0xe65   :  { %v3461_v30 = vpop.xlane.xlu0 %3460 }
 0xe66   :  { %5667 = vrcp.f32 %v3461_v30 }
 0xe69   :  { %v3458_v31 = vpop.xlane.xlu1 %3457 }
 0xe6a   :  { %5669 = vrcp.f32 %v3458_v31 }
 0xe73   :  { %v5668_v32 = vpop.eup %5667 }
 0xe74   :  { %v3489_v33 = vmul.f32 %v5668_v32, %v5652_v48 }
 0xe76   :  { %5454 = vmatmul.mubr.msk.f32.vlgmr.msra.gmra.mxu1 %vm589_vm4, %v3489_v33 }
 0xe77   :  { %v5670_v34 = vpop.eup %5669  ;;  %5462 = vmatpush3.msra.mxu1 %v2785_v25  ;;  %5463 = vmatprep.mubr.msk.f32.mxu1 %vm5749_vm3, %v5748_v5 }
 0xe78   :  { %v3488_v21 = vmul.f32 %v5670_v34, %v5654_v50  ;;  %5471 = vmatprep.subr.mxu1 %v5748_v5 }
 0xe7a   :  { %5449 = vmatmul.mubr.msk.f32.vlgmr.msra.gmra.mxu0 %vm589_vm4, %v3488_v21  ;;  %v4951_v21 = vld [vmem:[%s6502_s19] ss:$0 sm:$0xff] }
 0xe7b   :  { %5457 = vmatpush3.msra.mxu0 %v2783_v22  ;;  %5458 = vmatprep.mubr.msk.f32.mxu0 %vm5749_vm3, %v5748_v5 }
 0xe7c   :  { %5466 = vmatprep.subr.mxu0 %v5748_v5 }
 0xec1   :  { %v3464_v59 = vpop.xlane.xlu1 %3463 }
 0xec2   :  { %5671 = vrcp.f32 %v3464_v59 }
 0xec5   :  { %v3467_v35 = vpop.xlane.xlu0 %3466 }
 0xec6   :  { %5673 = vrcp.f32 %v3467_v35  ;;  %v3470_v36 = vpop.xlane.xlu1 %3469 }
 0xec7   :  { %5675 = vrcp.f32 %v3470_v36 }
 0xec9   :  { %v3473_v37 = vpop.xlane.xlu0 %3472 }
 0xeca   :  { %5677 = vrcp.f32 %v3473_v37  ;;  %v3476_v19 = vpop.xlane.xlu1 %3475 }
 0xecb   :  { %5679 = vrcp.f32 %v3476_v19 }
 0xecd   :  { %v3479_v20 = vpop.xlane.xlu0 %3478 }
 0xece   :  { %5681 = vrcp.f32 %v3479_v20  ;;  %v2797_v49 = vpop.permute.xlu1 %2796 }
 0xecf   :  { %v5672_v38 = vpop.eup %5671 }
 0xed0   :  { %v3490_v39 = vmul.f32 %v5672_v38, %v5656_v7 }
 0xed1   :  { %v2795_v45 = vpop.permute.xlu0 %2794 }
 0xed2   :  { %5459 = vmatmul.mubr.msk.f32.vlgmr.msra.gmra.mxu0 %vm589_vm4, %v3490_v39 }
 0xed3   :  { %v5674_v40 = vpop.eup %5673  ;;  %5467 = vmatpush3.msra.mxu0 %v2789_v23  ;;  %5468 = vmatprep.mubr.msk.f32.mxu0 %vm5749_vm3, %v5748_v5 }
 0xed4   :  { %v5676_v41 = vpop.eup %5675  ;;  %5476 = vmatprep.subr.mxu0 %v5748_v5  ;;  %v3491_v42 = vmul.f32 %v5674_v40, %v5658_v9 }
 0xed5   :  { %v3492_v43 = vmul.f32 %v5676_v41, %v5660_v10 }
 0xed6   :  { %5464 = vmatmul.mubr.msk.f32.vlgmr.msra.gmra.mxu1 %vm589_vm4, %v3491_v42 }
 0xed7   :  { %v5678_v44 = vpop.eup %5677  ;;  %5469 = vmatmul.mubr.msk.f32.vlgmr.msra.gmra.mxu0 %vm589_vm4, %v3492_v43  ;;  %5472 = vmatpush3.msra.mxu1 %v2791_v26 }
 0xed8   :  { %v5680_v46 = vpop.eup %5679  ;;  %5477 = vmatpush3.msra.mxu0 %v2795_v45  ;;  %5473 = vmatprep.mubr.msk.f32.mxu1 %vm5749_vm3, %v5748_v5  ;;  %v3493_v47 = vmul.f32 %v5678_v44, %v5662_v13 }
 0xed9   :  { %5478 = vmatprep.mubr.msk.f32.mxu0 %vm5749_vm3, %v5748_v5  ;;  %5481 = vmatprep.subr.mxu1 %v5748_v5  ;;  %v3494_v48 = vmul.f32 %v5680_v46, %v6343_v14  ;;  %v4480_v46 = vld [vmem:[%s6503_s24 + $0x18] sm:$0xff] }
 0xeda   :  { %5474 = vmatmul.mubr.msk.f32.vlgmr.msra.gmra.mxu1 %vm589_vm4, %v3493_v47  ;;  %5486 = vmatprep.subr.mxu0 %v4080_v29  ;;  %v4479_v47 = vld [vmem:[%s6503_s24 + $0x10] sm:$0xff] }
 0xedb   :  { %v5682_v50 = vpop.eup %5681  ;;  %5479 = vmatmul.mubr.msk.f32.vlgmr.msra.gmra.mxu0 %vm589_vm4, %v3494_v48  ;;  %5482 = vmatpush3.msra.mxu1 %v2797_v49  ;;  %v4478_v48 = vld [vmem:[%s6503_s24 + $0x8] sm:$0xff]  ;;  %v4477_v49 = vld [vmem:[%s6503_s24] sm:$0xff] }
 0xedc   :  { %5483 = vmatprep.mubr.msk.f32.mxu1 %vm5749_vm3, %v5748_v5  ;;  %v3495_v51 = vmul.f32 %v5682_v50, %v6348_v17  ;;  %5487 = vmatpush3.msra.mxu0 %v4080_v29  ;;  %v4586_v50 = vld [vmem:[%s6504_s30 + $0x78] sm:$0xff] }
 0xedd   :  { %5491 = vmatprep.subr.mxu1 %v4081_v52  ;;  %5496 = vmatprep.subr.mxu0 %v4082_v53 }
 0xede   :  { %5484 = vmatmul.mubr.msk.f32.vlgmr.msra.gmra.mxu1 %vm589_vm4, %v3495_v51  ;;  %v4585_v51 = vld [vmem:[%s6504_s30 + $0x70] sm:$0xff] }
 0xedf   :  { %5492 = vmatpush3.msra.mxu1 %v4081_v52  ;;  %v4584_v52 = vld [vmem:[%s6504_s30 + $0x68] sm:$0xff] }
 0xee0   :  { %5501 = vmatprep.subr.mxu1 %v4083_v54 }
 0xf36   :  { %v3638_v55 = vpop.f32.mrf.mxu1 }
 0xf38   :  { %v5455_v56 = vpop.f32.mrf.mxu1 }
 0xf39   :  { %v4580_v56 = vld [vmem:[%s6504_s30 + $0x48] sm:$0xff] }
 0xf3a   :  { %v3565_v57 = vpop.f32.mrf.mxu0 }
 0xf3b   :  { %5488 = vmatprep.mubr.msk.f32.mxu0 %vm589_vm4, %v3565_v57  ;;  %v4579_v57 = vld [vmem:[%s6504_s30 + $0x40] sm:$0xff] }
 0xf3c   :  { %v5450_v24 = vpop.f32.mrf.mxu0  ;;  %5489 = vmatmul.mubr.msk.f32.vlgmr.msra.gmra.mxu0 %vm589_vm4, %v3638_v55  ;;  %v4581_v55 = vld [vmem:[%s6504_s30 + $0x50] sm:$0xff] }
 0xf3d   :  { %5497 = vmatpush3.msra.mxu0 %v4082_v53  ;;  %v4583_v53 = vld [vmem:[%s6504_s30 + $0x60] sm:$0xff]  ;;  %v4578_v24 = vld [vmem:[%s6504_s30 + $0x38] sm:$0xff] }
 0xf3e   :  { %5506 = vmatprep.subr.mxu0 %v4480_v46 }
 0xf92   :  { %v3711_v5 = vpop.f32.mrf.mxu0 }
 0xf93   :  { %5493 = vmatprep.mubr.msk.f32.mxu1 %vm589_vm4, %v3711_v5  ;;  %v4577_v5 = vld [vmem:[%s6504_s30 + $0x30] sm:$0xff] }
 0xf94   :  { %v5460_v58 = vpop.f32.mrf.mxu0 }
 0xf95   :  { %v4576_v58 = vld [vmem:[%s6504_s30 + $0x28] sm:$0xff] }
 0xf96   :  { %v3784_v60 = vpop.f32.mrf.mxu1 }
 0xf97   :  { %v3857_v61 = vpop.f32.mrf.mxu0  ;;  %5494 = vmatmul.mubr.msk.f32.vlgmr.msra.gmra.mxu1 %vm589_vm4, %v3784_v60  ;;  %v4575_v60 = vld [vmem:[%s6504_s30 + $0x20] sm:$0xff] }
 0xf98   :  { %5498 = vmatprep.mubr.msk.f32.mxu0 %vm589_vm4, %v3857_v61  ;;  %v5465_v0 = vpop.f32.mrf.mxu1  ;;  %5502 = vmatpush3.msra.mxu1 %v4083_v54  ;;  %v4582_v54 = vld [vmem:[%s6504_s30 + $0x58] sm:$0xff] }
 0xf99   :  { %v5470_v3 = vpop.f32.mrf.mxu0  ;;  %5517 = vmatprep.subr.mxu1 %v4586_v50 }
 0xf9a   :  { %v3930_v28 = vpop.f32.mrf.mxu1 }
 0xf9b   :  { %v4003_v4 = vpop.f32.mrf.mxu0  ;;  %5499 = vmatmul.mubr.msk.f32.vlgmr.msra.gmra.mxu0 %vm589_vm4, %v3930_v28 }
 0xf9c   :  { %5503 = vmatprep.mubr.msk.f32.mxu1 %vm589_vm4, %v4003_v4  ;;  %v5475_v63 = vpop.f32.mrf.mxu1  ;;  %5507 = vmatpush3.msra.mxu0 %v4480_v46  ;;  %v4718_v46 = vld [vmem:[%s5919_s20 + $0x8] sm:$0xff] }
 0xf9d   :  { %v5480_v6 = vpop.f32.mrf.mxu0  ;;  %5508 = vmatprep.subr.mxu0 %v4479_v47 }
 0xf9e   :  { %v4076_v27 = vpop.f32.mrf.mxu1  ;;  %5509 = vmatpush3.msra.mxu0 %v4479_v47  ;;  %v4717_v47 = vld [vmem:[%s5919_s20] sm:$0xff] }
 0xf9f   :  { %5504 = vmatmul.mubr.msk.f32.vlgmr.msra.gmra.mxu1 %vm589_vm4, %v4076_v27  ;;  %5510 = vmatprep.subr.mxu0 %v4478_v48  ;;  %v4952_v27 = vld [vmem:[%s6505_s12] ss:$0 sm:$0xff] }
 0xfa0   :  { %v5485_v1 = vpop.f32.mrf.mxu1  ;;  %5511 = vmatpush3.msra.mxu0 %v4478_v48  ;;  %5518 = vmatpush3.msra.mxu1 %v4586_v50 }
 0xfa1   :  { %5512 = vmatprep.subr.mxu0 %v4477_v49  ;;  %5519 = vmatprep.subr.mxu1 %v4585_v51 }
 0xfa2   :  { %5513 = vmatpush3.msra.mxu0 %v4477_v49  ;;  %5520 = vmatpush3.msra.mxu1 %v4585_v51 }
 0xfa3   :  { %5521 = vmatprep.subr.mxu1 %v4584_v52 }
 0xfa4   :  { %5522 = vmatpush3.msra.mxu1 %v4584_v52 }
 0xfa5   :  { %5523 = vmatprep.subr.mxu1 %v4583_v53 }
 0xfa6   :  { %5524 = vmatpush3.msra.mxu1 %v4583_v53 }
 0xfa7   :  { %5525 = vmatprep.subr.mxu1 %v4582_v54 }
 0xfa8   :  { %5526 = vmatpush3.msra.mxu1 %v4582_v54 }
 0xfa9   :  { %5527 = vmatprep.subr.mxu1 %v4581_v55 }
 0xfaa   :  { %5528 = vmatpush3.msra.mxu1 %v4581_v55  ;;  %v4958_v55 = vld [vmem:[%s6509_s15] ss:$0 sm:$0xff] }
 0xfab   :  { %5529 = vmatprep.subr.mxu1 %v4580_v56 }
 0xfac   :  { %5530 = vmatpush3.msra.mxu1 %v4580_v56 }
 0xfad   :  { %5531 = vmatprep.subr.mxu1 %v4579_v57 }
 0xfae   :  { %5532 = vmatpush3.msra.mxu1 %v4579_v57 }
 0xfaf   :  { %5533 = vmatprep.subr.mxu1 %v4578_v24 }
 0xfb0   :  { %5534 = vmatpush3.msra.mxu1 %v4578_v24 }
 0xfb1   :  { %5535 = vmatprep.subr.mxu1 %v4577_v5 }
 0xfb2   :  { %5536 = vmatpush3.msra.mxu1 %v4577_v5 }
 0xfb3   :  { %5537 = vmatprep.subr.mxu1 %v4576_v58 }
 0xfb4   :  { %5538 = vmatpush3.msra.mxu1 %v4576_v58  ;;  %v4959_v58 = vld [vmem:[%s5914_s6] ss:$0 sm:$0xff] }
 0xfb5   :  { %5539 = vmatprep.subr.mxu1 %v4575_v60 }
 0xfb6   :  { %5540 = vmatpush3.msra.mxu1 %v4575_v60 }
 0xffc   :  { %v5490_v7 = vpop.f32.mrf.mxu0 }
 0xffd   :  { %v4415_v13 = vsel %vm254_vm2, %v5490_v7, 0.0  ;;  %v4953_v7 = vld [vmem:[%s6506_s7] ss:$0 sm:$0xff] }
 0xffe   :  { %v4156_v9 = vpop.f32.mrf.mxu0 }
 0xfff   :  { %v4408_v18 = vsel %vm254_vm2, %v4156_v9, 0.0 }
0x1057   :  { %v5495_v8 = vpop.f32.mrf.mxu1 }
0x1058   :  { %v4416_v11 = vsel %vm254_vm2, %v5495_v8, 0.0 }
0x1059   :  { %v4237_v10 = vpop.f32.mrf.mxu1  ;;  %v4417_v16 = vadd.f32 %v4416_v11, %v4415_v13 }
0x105a   :  { %v4409_v14 = vsel %vm254_vm2, %v4237_v10, 0.0 }
0x105b   :  { %v5500_v12 = vpop.f32.mrf.mxu0  ;;  %v4410_v23 = vadd.f32 %v4409_v14, %v4408_v18  ;;  %v4574_v14 = vld [vmem:[%s6504_s30 + $0x18] sm:$0xff]  ;;  %v4954_v18 = vld [vmem:[%s6507_s10] ss:$0 sm:$0xff] }
0x105c   :  { %v4418_v15 = vsel %vm254_vm2, %v5500_v12, 0.0  ;;  %5541 = vmatprep.subr.mxu1 %v4574_v14 }
0x105d   :  { %v4318_v17 = vpop.f32.mrf.mxu0  ;;  %v4419_v25 = vadd.f32 %v4418_v15, %v4417_v16  ;;  %5542 = vmatpush3.msra.mxu1 %v4574_v14  ;;  %v4573_v15 = vld [vmem:[%s6504_s30 + $0x10] sm:$0xff]  ;;  %v4572_v16 = vld [vmem:[%s6504_s30 + $0x8] sm:$0xff] }
0x105e   :  { %v4411_v22 = vsel %vm254_vm2, %v4318_v17, 0.0  ;;  %5543 = vmatprep.subr.mxu1 %v4573_v15  ;;  %v4571_v17 = vld [vmem:[%s6504_s30] sm:$0xff] }
0x105f   :  { %v5505_v26 = vpop.f32.mrf.mxu1  ;;  %v4412_v31 = vadd.f32 %v4411_v22, %v4410_v23  ;;  %5544 = vmatpush3.msra.mxu1 %v4573_v15 }
0x1060   :  { %v4420_v30 = vsel %vm254_vm2, %v5505_v26, 0.0  ;;  %5545 = vmatprep.subr.mxu1 %v4572_v16 }
0x1061   :  { %v4421_v32 = vadd.f32 %v4420_v30, %v4419_v25  ;;  %v4399_v33 = vpop.f32.mrf.mxu1  ;;  %5546 = vmatpush3.msra.mxu1 %v4572_v16 }
0x1062   :  { %v4413_v34 = vsel %vm254_vm2, %v4399_v33, 0.0  ;;  %5547 = vmatprep.subr.mxu1 %v4571_v17  ;;  %v4957_v33 = vld [vmem:[%s6508_s11] ss:$0 sm:$0xff] }
0x1063   :  { %v4423_v59 = vadd.f32 %v4421_v32, %v6210_v62  ;;  %v4414_v35 = vadd.f32 %v4413_v34, %v4412_v31  ;;  %5548 = vmatpush3.msra.mxu1 %v4571_v17 }
0x1065   :  { %v4422_v36 = vadd.f32 %v4414_v35, %v6213_v2  ;;  %v6405_v37 = vadd.f32 %v4951_v21, %v4423_v59 }
0x1067   :  { %v4438_v19 = vsel %vm254_vm2, %v6405_v37, 0.0  ;;  %v6409_v20 = vadd.f32 %v4951_v21, %v4422_v36 }
0x1068   :  { %4439 = vadd.xlane.f32.xlu1 %v4438_v19 }
0x1069   :  { %v4435_v38 = vsel %vm254_vm2, %v6409_v20, 0.0 }
0x106a   :  { %4436 = vadd.xlane.f32.xlu0 %v4435_v38 }
0x10f1   :  { %v4440_v39 = vpop.xlane.xlu1 %4439 }
0x10f2   :  { %v4442_v62 = vmul.f32 0.03125, %v4440_v39 }
0x10f3   :  { %v4437_v40 = vpop.xlane.xlu0 %4436 }
0x10f4   :  { %v4441_v41 = vmul.f32 0.03125, %v4437_v40  ;;  %v6414_v2 = vsub.f32 %v6405_v37, %v4442_v62 }
0x10f6   :  { %v6417_v42 = vsub.f32 %v6409_v20, %v4441_v41  ;;  %v4446_v45 = vmul.f32 %v6414_v2, %v6414_v2 }
0x10f8   :  { %v4445_v43 = vmul.f32 %v6417_v42, %v6417_v42  ;;  %v4450_v29 = vsel %vm254_vm2, %v4446_v45, 0.0  ;;  %v4720_v45 = vld [vmem:[%s5919_s20 + $0x18] sm:$0xff] }
0x10f9   :  { %5552 = vmatprep.subr.mxu0 %v4720_v45 }
0x10fa   :  { %v4447_v44 = vsel %vm254_vm2, %v4445_v43, 0.0 }
0x10fb   :  { %4448 = vadd.xlane.f32.xlu0 %v4447_v44 }
0x10ff   :  { %4451 = vadd.xlane.f32.xlu0 %v4450_v29  ;;  %v4719_v29 = vld [vmem:[%s5919_s20 + $0x10] sm:$0xff]  ;;  %s5753_s20 = smov [#allocation2]  }
0x1100   :  { %s4816_s16 = sshll.u32 %s5753_s20, 4  ;;  %s4817_s16 = int_to_ptr.vmem [resolvable:$true] %s4816_s16 }
0x1101   :  { %s5691_s18 = scalar_lea.vmem %s4817_s16, 256  ;;  %p5696_p1 = scmp.lt.s32.totalorder %s4817_s16, %s4817_s16 }
0x1102   :  { %p5692_p0 = scmp.ne.s32.totalorder %s4817_s16, %s5691_s18  ;;  %p5697_p2 = scmp.lt.s32.totalorder %s5691_s18, %s5691_s18 }
0x1104   :  { %p5698_p3 = por %p5697_p2, %p5696_p1 }
0x1106   :  { %p5699_p4 = pnand %p5698_p3, %p5692_p0 }
0x1184   :  { %v4449_v61 = vpop.xlane.xlu0 %4448 }
0x1185   :  { %v4453_v0 = vmul.f32 0.03125, %v4449_v61 }
0x1187   :  { %v4455_v3 = vadd.f32 1e-05, %v4453_v0 }
0x1188   :  { %v4452_v28 = vpop.xlane.xlu0 %4451 }
0x1189   :  { %5683 = vrsqrt.f32 %v4455_v3  ;;  %v4454_v4 = vmul.f32 0.03125, %v4452_v28  ;;  %v4960_v3 = vld [vmem:[%s5924_s27] ss:$0 sm:$0xff] }
0x118b   :  { %v4456_v63 = vadd.f32 1e-05, %v4454_v4 }
0x118d   :  { %5685 = vrsqrt.f32 %v4456_v63 }
0x1196   :  { %v5684_v6 = vpop.eup %5683 }
0x1197   :  { %v4459_v1 = vmul.f32 %v5684_v6, %v6417_v42 }
0x1199   :  { %v4467_v8 = vmul.f32 %v4952_v27, %v4459_v1 }
0x119a   :  { %v5686_v9 = vpop.eup %5685 }
0x119b   :  { %v4460_v10 = vmul.f32 %v5686_v9, %v6414_v2  ;;  %v4475_v11 = vadd.f32 %v4953_v7, %v4467_v8 }
0x119d   :  { %v4468_v12 = vmul.f32 %v4952_v27, %v4460_v10  ;;  %5514 = vmatprep.mubr.msk.f32.mxu0 %vm254_vm2, %v4475_v11 }
0x119f   :  { %v4476_v13 = vadd.f32 %v4953_v7, %v4468_v12 }
0x11a1   :  { %5515 = vmatmul.mubr.msk.f32.vlgmr.msra.gmra.mxu0 %vm254_vm2, %v4476_v13 }
0x11a2   :  { %5553 = vmatpush3.msra.mxu0 %v4720_v45 }
0x11a3   :  { %5554 = vmatprep.subr.mxu0 %v4719_v29 }
0x11a4   :  { %5555 = vmatpush3.msra.mxu0 %v4719_v29 }
0x11a5   :  { %5556 = vmatprep.subr.mxu0 %v4718_v46 }
0x11a6   :  { %5557 = vmatpush3.msra.mxu0 %v4718_v46 }
0x11a7   :  { %5558 = vmatprep.subr.mxu0 %v4717_v47 }
0x11a8   :  { %5559 = vmatpush3.msra.mxu0 %v4717_v47 }
0x1261   :  { %v5516_v22 = vpop.f32.mrf.mxu0 }
0x1262   :  { %v4566_v23 = vadd.f32 %v5516_v22, %v4954_v18 }
0x1263   :  { %v4560_v25 = vpop.f32.mrf.mxu0 }
0x1264   :  { %v4561_v26 = vadd.f32 %v4954_v18, %v4560_v25  ;;  %v4570_v31 = vmax.f32 %v4566_v23, 0.0 }
0x1266   :  { %v4569_v30 = vmax.f32 %v4561_v26, 0.0 }
0x1268   :  { %5549 = vmatprep.mubr.f32.mxu1 %v4569_v30 }
0x1269   :  { %5550 = vmatmul.mubr.f32.vlgmr.msra.gmra.mxu1 %v4570_v31 }
0x1329   :  { %v5551_v32 = vpop.f32.mrf.mxu1 }
0x132a   :  { %v4663_v34 = vadd.f32 %v5551_v32, %v6405_v37 }
0x132b   :  { %v4653_v21 = vpop.f32.mrf.mxu1 }
0x132c   :  { %v4662_v59 = vadd.f32 %v4653_v21, %v6409_v20  ;;  %v4672_v35 = vadd.f32 %v4957_v33, %v4663_v34 }
0x132e   :  { %v4678_v36 = vsel %vm254_vm2, %v4672_v35, 0.0  ;;  %v4671_v19 = vadd.f32 %v4957_v33, %v4662_v59 }
0x132f   :  { %4679 = vadd.xlane.f32.xlu0 %v4678_v36 }
0x1330   :  { %v4675_v38 = vsel %vm254_vm2, %v4671_v19, 0.0 }
0x1331   :  { %4676 = vadd.xlane.f32.xlu1 %v4675_v38 }
0x13b8   :  { %v4680_v39 = vpop.xlane.xlu0 %4679 }
0x13b9   :  { %v4682_v62 = vmul.f32 0.03125, %v4680_v39 }
0x13ba   :  { %v4677_v40 = vpop.xlane.xlu1 %4676 }
0x13bb   :  { %v4684_v41 = vsub.f32 %v4672_v35, %v4682_v62  ;;  %v4681_v37 = vmul.f32 0.03125, %v4677_v40 }
0x13bd   :  { %v4683_v2 = vsub.f32 %v4671_v19, %v4681_v37  ;;  %v4686_v42 = vmul.f32 %v4684_v41, %v4684_v41 }
0x13bf   :  { %v4690_v20 = vsel %vm254_vm2, %v4686_v42, 0.0  ;;  %v4685_v43 = vmul.f32 %v4683_v2, %v4683_v2 }
0x13c0   :  { %4691 = vadd.xlane.f32.xlu0 %v4690_v20 }
0x13c1   :  { %v4687_v44 = vsel %vm254_vm2, %v4685_v43, 0.0 }
0x13c2   :  { %4688 = vadd.xlane.f32.xlu1 %v4687_v44 }
0x1449   :  { %v4692_v48 = vpop.xlane.xlu0 %4691 }
0x144a   :  { %v4694_v49 = vmul.f32 0.03125, %v4692_v48 }
0x144b   :  { %v4689_v50 = vpop.xlane.xlu1 %4688 }
0x144c   :  { %v4696_v51 = vadd.f32 1e-05, %v4694_v49  ;;  %v4693_v52 = vmul.f32 0.03125, %v4689_v50 }
0x144e   :  { %5687 = vrsqrt.f32 %v4696_v51  ;;  %v4695_v53 = vadd.f32 1e-05, %v4693_v52 }
0x1450   :  { %5689 = vrsqrt.f32 %v4695_v53 }
0x145b   :  { %v5688_v54 = vpop.eup %5687 }
0x145c   :  { %v4700_v56 = vmul.f32 %v5688_v54, %v4684_v41 }
0x145d   :  { %v5690_v57 = vpop.eup %5689 }
0x145e   :  { %v4699_v24 = vmul.f32 %v5690_v57, %v4683_v2  ;;  %v4708_v5 = vmul.f32 %v4958_v55, %v4700_v56 }
0x1460   :  { %v4707_v60 = vmul.f32 %v4958_v55, %v4699_v24  ;;  %v4716_v0 = vadd.f32 %v4959_v58, %v4708_v5 }
0x1462   :  { %v4715_v61 = vadd.f32 %v4959_v58, %v4707_v60 }
0x1464   :  { %5560 = vmatprep.mubr.msk.f32.mxu0 %vm254_vm2, %v4715_v61 }
0x1465   :  { %5561 = vmatmul.mubr.msk.f32.vlgmr.msra.gmra.mxu0 %vm254_vm2, %v4716_v0 }
0x1525   :  { %v5562_v28 = vpop.f32.mrf.mxu0 }
0x1526   :  { %v4806_v4 = vadd.f32 %v5562_v28, %v4960_v3 }
0x1527   :  { %v4800_v63 = vpop.f32.mrf.mxu0 }
0x1528   :  { %4810 = vst [vmem:[#allocation2 + $0x8] sm:$0xff] %v4806_v4  ;;  %v4801_v6 = vadd.f32 %v4960_v3, %v4800_v63 }
0x152a   :  { %4809 = vst [vmem:[#allocation2] sm:$0xff] %v4801_v6 }
0x152b   :  { %5702 = shalt.err (!%p5699_p4)
}
0x152c   :  { %s5754_s6 = smov 128   ;;  %s5755_s22 = smov 8  }
0x152d   :  { %4822 = dma.vmem_to_hbm [thread:$0]  %s4817_s16, 256, %s5929_s4, [#allocation3], %s5754_s6, %s5754_s6, %s5755_s22  }
0x152e   :  { %5711 = dma.done.wait [#allocation3], 256  }
0x152f   :  { %5712 = vsyncadd [#allocation3], 4294967040 }
0x1530   :  { %4826 = vsyncpa [#allocation3], 1 }

</bundles_post_ra>
